<compile_context>
chip_gen: v7x
topology: tpu7x:2x2x1
jax: 0.10.0
libtpu: 0.0.40
codegen_flags: <defaults>
</compile_context>

<pallas_src>
import functools

import jax
import jax.numpy as jnp
from jax.experimental import pallas as pl
from jax.experimental.pallas import tpu as pltpu


def mha_kernel(*refs, G, hd, mask_fill, has_mask, emit_attn):
    refs = list(refs)
    q_ref, k_ref, v_ref = refs[0], refs[1], refs[2]
    pos = 3
    mask_ref = None
    if has_mask:
        mask_ref = refs[pos]
        pos += 1
    (wq_ref, bq_ref, wk_ref, bk_ref,
     wv_ref, bv_ref, wo_ref, bo_ref) = refs[pos:pos + 8]
    pos += 8
    out_ref = refs[pos]
    pos += 1
    attn_ref = refs[pos] if emit_attn else None

    hg = pl.program_id(2)                    # head-group axis (innermost, reduction)
    B_blk, TQ, H = q_ref.shape
    S = k_ref.shape[1]

    # Head-group weight slices (bf16), loaded once per step.
    Wq = wq_ref[0]                           # (H, G*hd), inv_scale pre-folded
    Wk = wk_ref[0]
    Wv = wv_ref[0]
    Wo = wo_ref[0]                           # (G*hd, H)
    bq = bq_ref[0]                           # (1, G*hd) f32, inv_scale pre-folded
    bk = bk_ref[0]
    bv = bv_ref[0]

    @pl.when(hg == 0)
    def _():
        # Output block is resident across the head-group axis (same block index):
        # initialize it once with the output-projection bias; head-group
        # contributions accumulate directly on top (no separate scratch).
        out_ref[...] = jnp.broadcast_to(
            bo_ref[...].reshape(1, 1, H), (B_blk, TQ, H)).astype(out_ref.dtype)

    for b in range(B_blk):
        # Per-head-group projections: bf16 operands, f32 accumulation on the MXU.
        # 1/scale is folded into Wq/bq on the host.
        Qb = (jnp.dot(q_ref[b], Wq, preferred_element_type=jnp.float32) + bq
              ).astype(jnp.bfloat16)                              # (TQ, G*hd)
        Kb = (jnp.dot(k_ref[b], Wk, preferred_element_type=jnp.float32) + bk
              ).astype(jnp.bfloat16)                              # (S,  G*hd)
        Vb = (jnp.dot(v_ref[b], Wv, preferred_element_type=jnp.float32) + bv
              ).astype(jnp.bfloat16)                              # (S,  G*hd)
        if has_mask:
            mb = mask_ref[b]                                      # (TQ, S) int8

        contrib = jnp.zeros((TQ, H), jnp.float32)
        for g in range(G):
            lo, hi = g * hd, (g + 1) * hd
            # Q @ K^T without materializing a transpose: contract last dims.
            energy = jax.lax.dot_general(
                Qb[:, lo:hi], Kb[:, lo:hi],
                dimension_numbers=(((1,), (1,)), ((), ())),
                preferred_element_type=jnp.float32)               # (TQ, S) f32
            if has_mask:
                energy = jnp.where(mb == 0, mask_fill, energy)

            # Numerically stable softmax in f32; reciprocal on the EUP slot.
            # (approx=True: rows sum to 1 only to ~1e-3; renormalize downstream
            #  if exact probabilities are required.)
            m = jnp.max(energy, axis=-1, keepdims=True)
            p = jnp.exp(energy - m)
            denom = jnp.sum(p, axis=-1, keepdims=True)
            attn = (p * pl.reciprocal(denom, approx=True)).astype(jnp.bfloat16)

            if emit_attn:
                attn_ref[b, g] = attn                             # lane-dense bf16

            ctx = jnp.dot(attn, Vb[:, lo:hi],
                          preferred_element_type=jnp.float32)     # (TQ, hd)
            contrib = contrib + jnp.dot(
                ctx.astype(jnp.bfloat16), Wo[lo:hi, :],
                preferred_element_type=jnp.float32)               # (TQ, H)

        out_ref[b] = out_ref[b] + contrib.astype(out_ref.dtype)


def multihead_attention(query, key, value, params, *, n_heads, mask=None,
                        fp16=False, return_attention=True):
    bs, S, H = query.shape
    hd = H // n_heads
    inv_scale = 1.0 / float(hd) ** 0.5
    mask_fill = -65504.0 if fp16 else -1e10

    # --- static tiling choices -------------------------------------------------
    # Gang heads so the projection width is >=256 (v6e/v7x MXU) when possible.
    G = max(1, min(n_heads, 256 // max(hd, 1)))
    while n_heads % G:
        G -= 1
    n_groups = n_heads // G
    ghd = G * hd

    # Query tile: largest of (512, 256, 128) dividing S, else the full S.
    TQ = S
    for cand in (512, 256, 128):
        if S % cand == 0:
            TQ = cand
            break
    n_qt = S // TQ

    # Batch block: amortize weight DMA over a few batches.
    B_blk = min(bs, 4)
    while bs % B_blk:
        B_blk -= 1
    n_bb = bs // B_blk

    wq, bq, wk, bk, wv, bv, wo, bo = params

    # --- host-side layout plumbing (bf16 weights, per-head-group slices) -------
    def group_cols(w, scale=None):          # (H, H) -> (n_groups, H, G*hd)
        w = w if scale is None else w * scale
        return jnp.transpose(w.reshape(H, n_groups, ghd), (1, 0, 2)).astype(jnp.bfloat16)

    def group_bias(b, scale=None):          # (1, H) -> (n_groups, 1, G*hd), f32
        b = b if scale is None else b * scale
        return b.reshape(n_groups, 1, ghd).astype(jnp.float32)

    # inv_scale folded into the Q projection (weight + bias) once, on the host.
    wq_g = group_cols(wq, inv_scale)
    bq_g = group_bias(bq, inv_scale)
    wk_g, bk_g = group_cols(wk), group_bias(bk)
    wv_g, bv_g = group_cols(wv), group_bias(bv)
    wo_g = wo.reshape(n_groups, ghd, H).astype(jnp.bfloat16)
    bo_f = bo.astype(jnp.float32)

    q_bf = query.astype(jnp.bfloat16)
    k_bf = key.astype(jnp.bfloat16)
    v_bf = value.astype(jnp.bfloat16)

    has_mask = mask is not None
    emit_attn = return_attention

    # --- BlockSpecs ------------------------------------------------------------
    q_spec = pl.BlockSpec((B_blk, TQ, H), lambda bb, qt, hg: (bb, qt, 0))
    kv_spec = pl.BlockSpec((B_blk, S, H), lambda bb, qt, hg: (bb, 0, 0))
    w_spec = pl.BlockSpec((1, H, ghd), lambda bb, qt, hg: (hg, 0, 0))
    b_spec = pl.BlockSpec((1, 1, ghd), lambda bb, qt, hg: (hg, 0, 0))
    wo_spec = pl.BlockSpec((1, ghd, H), lambda bb, qt, hg: (hg, 0, 0))
    bo_spec = pl.BlockSpec((1, H), lambda bb, qt, hg: (0, 0))
    out_spec = pl.BlockSpec((B_blk, TQ, H), lambda bb, qt, hg: (bb, qt, 0))

    in_arrays = [q_bf, k_bf, v_bf]
    in_specs = [q_spec, kv_spec, kv_spec]
    if has_mask:
        # int8 mask, head-broadcast, streamed per (batch_block, q_tile) and
        # re-used (no re-DMA) across the head-group axis.
        mask_i8 = (jnp.broadcast_to(mask, (bs, 1, S, S))[:, 0] != 0).astype(jnp.int8)
        in_arrays.append(mask_i8)
        in_specs.append(pl.BlockSpec((B_blk, TQ, S), lambda bb, qt, hg: (bb, qt, 0)))
    in_arrays += [wq_g, bq_g, wk_g, bk_g, wv_g, bv_g, wo_g, bo_f]
    in_specs += [w_spec, b_spec, w_spec, b_spec, w_spec, b_spec, wo_spec, bo_spec]

    out_shapes = [jax.ShapeDtypeStruct((bs, S, H), query.dtype)]
    out_specs = [out_spec]
    if emit_attn:
        out_shapes.append(jax.ShapeDtypeStruct((bs, n_heads, S, S), jnp.bfloat16))
        out_specs.append(
            pl.BlockSpec((B_blk, G, TQ, S), lambda bb, qt, hg: (bb, hg, qt, 0)))

    # --- VMEM budget (explicit; v7x only has 64 MiB physical) ------------------
    block_bytes = (
        B_blk * TQ * H * 2                       # q (bf16)
        + 2 * B_blk * S * H * 2                  # k, v (bf16)
        + (B_blk * TQ * S if has_mask else 0)    # mask (int8)
        + 3 * (H * ghd * 2 + ghd * 4)            # wq/wk/wv (bf16) + biases (f32)
        + ghd * H * 2 + H * 4                    # wo (bf16) + bo (f32)
        + B_blk * TQ * H * 4                     # out (f32)
        + (B_blk * G * TQ * S * 2 if emit_attn else 0))  # attn (bf16)
    vmem_limit = int(min(64 << 20, max(16 << 20, 3 * block_bytes)))

    kernel = functools.partial(mha_kernel, G=G, hd=hd, mask_fill=mask_fill,
                               has_mask=has_mask, emit_attn=emit_attn)

    results = pl.pallas_call(
        kernel,
        out_shape=tuple(out_shapes),
        grid_spec=pltpu.PrefetchScalarGridSpec(
            num_scalar_prefetch=0,
            grid=(n_bb, n_qt, n_groups),
            in_specs=in_specs,
            out_specs=out_specs),
        compiler_params=pltpu.CompilerParams(
            dimension_semantics=("parallel", "parallel", "arbitrary"),
            vmem_limit_bytes=vmem_limit),
    )(*in_arrays)

    if emit_attn:
        out, attn = results
        return out, attn
    return results[0], None


def init_params(key, hidden_dim):
    # Deterministic synthetic init (nn.Linear shapes; weights stored
    # pre-transposed as (in, out) so y = x @ W + b).
    ks = jax.random.split(key, 8)
    scale = 1.0 / jnp.sqrt(jnp.float32(hidden_dim))

    def lin(kw, kb):
        w = jax.random.uniform(kw, (hidden_dim, hidden_dim),
                               minval=-scale, maxval=scale, dtype=jnp.float32)
        b = jax.random.uniform(kb, (1, hidden_dim),
                               minval=-scale, maxval=scale, dtype=jnp.float32)
        return w, b

    wq, bq = lin(ks[0], ks[1])
    wk, bk = lin(ks[2], ks[3])
    wv, bv = lin(ks[4], ks[5])
    wo, bo = lin(ks[6], ks[7])
    return (wq, bq, wk, bk, wv, bv, wo, bo)


def reference(query, key, value, params, *, n_heads, mask=None, fp16=False):
    # Pure-JAX reference mirroring the PyTorch forward (eval-mode dropout),
    # with bf16 rounding applied at the same points the kernel feeds the MXU
    # so the comparison isolates kernel bugs rather than bf16 quantization.
    bs, S, H = query.shape
    hd = H // n_heads
    wq, bq, wk, bk, wv, bv, wo, bo = params
    inv_scale = 1.0 / float(hd) ** 0.5
    mask_fill = -65504.0 if fp16 else -1e10
    hi = jax.lax.Precision.HIGHEST
    r16 = lambda x: x.astype(jnp.bfloat16).astype(jnp.float32)

    def proj(x, w, b):
        y = jnp.dot(r16(x), r16(w), precision=hi) + b
        return y.reshape(bs, S, n_heads, hd).transpose(0, 2, 1, 3)

    Q = proj(query, wq, bq) * inv_scale
    K = proj(key, wk, bk)
    V = proj(value, wv, bv)
    energy = jnp.einsum("bhqd,bhkd->bhqk", r16(Q), r16(K), precision=hi)
    if mask is not None:
        energy = jnp.where(mask == 0, mask_fill, energy)
    attn = jax.nn.softmax(energy, axis=-1)
    x = jnp.einsum("bhqk,bhkd->bhqd", r16(attn), r16(V), precision=hi)
    x = x.transpose(0, 2, 1, 3).reshape(bs, S, H)
    x = jnp.dot(r16(x), r16(wo), precision=hi) + bo
    return x, attn


if __name__ == "__main__":
    bs, S, H, n_heads = 2, 8, 32, 4

    key = jax.random.PRNGKey(0)
    k_q, k_k, k_v, k_p = jax.random.split(key, 4)
    query = jax.random.normal(k_q, (bs, S, H), dtype=jnp.float32)
    key_in = jax.random.normal(k_k, (bs, S, H), dtype=jnp.float32)
    value = jax.random.normal(k_v, (bs, S, H), dtype=jnp.float32)
    params = init_params(k_p, H)

    # Tolerances cover MXU-bf16 accumulation, the host-side inv_scale fold,
    # the bf16 attention output, and pl.reciprocal(approx=True).
    TOL = 2e-2

    # Path 1: no mask (specialized kernel, no mask input at all).
    out, attn = multihead_attention(query, key_in, value, params,
                                    n_heads=n_heads, mask=None)
    jax.block_until_ready((out, attn))
    ref_out, ref_attn = reference(query, key_in, value, params,
                                  n_heads=n_heads, mask=None)
    assert jnp.allclose(out, ref_out, atol=TOL, rtol=TOL)
    assert jnp.allclose(attn.astype(jnp.float32), ref_attn, atol=TOL, rtol=TOL)

    # Path 2: causal mask (streamed as int8 inside the kernel).
    causal = jnp.tril(jnp.ones((S, S), dtype=jnp.float32))[None, None]  # (1,1,S,S)
    out_m, attn_m = multihead_attention(query, key_in, value, params,
                                        n_heads=n_heads, mask=causal)
    jax.block_until_ready((out_m, attn_m))
    ref_out_m, ref_attn_m = reference(query, key_in, value, params,
                                      n_heads=n_heads, mask=causal)
    assert jnp.allclose(out_m, ref_out_m, atol=TOL, rtol=TOL)
    assert jnp.allclose(attn_m.astype(jnp.float32), ref_attn_m, atol=TOL, rtol=TOL)

    print("KERNEL_OK")
</pallas_src>

<mosaic_0001>
module attributes {stable_mosaic.version = 11 : i64} {
  func.func @mha_kernel(%arg0: i32, %arg1: i32, %arg2: i32, %arg3: memref<2x8x32xbf16, #tpu.memory_space<vmem>>, %arg4: memref<2x8x32xbf16, #tpu.memory_space<vmem>>, %arg5: memref<2x8x32xbf16, #tpu.memory_space<vmem>>, %arg6: memref<1x32x32xbf16, #tpu.memory_space<vmem>>, %arg7: memref<1x1x32xf32, #tpu.memory_space<vmem>>, %arg8: memref<1x32x32xbf16, #tpu.memory_space<vmem>>, %arg9: memref<1x1x32xf32, #tpu.memory_space<vmem>>, %arg10: memref<1x32x32xbf16, #tpu.memory_space<vmem>>, %arg11: memref<1x1x32xf32, #tpu.memory_space<vmem>>, %arg12: memref<1x32x32xbf16, #tpu.memory_space<vmem>>, %arg13: memref<1x32xf32, #tpu.memory_space<vmem>>, %arg14: memref<2x8x32xf32, #tpu.memory_space<vmem>>, %arg15: memref<2x4x8x8xbf16, #tpu.memory_space<vmem>>) attributes {dimension_semantics = [#tpu.dimension_semantics<parallel>, #tpu.dimension_semantics<parallel>, #tpu.dimension_semantics<arbitrary>], iteration_bounds = array<i64: 1, 1, 1>, scalar_prefetch = 0 : i64, scratch_operands = 0 : i64, tpu.core_type = #tpu.core_type<tc>, window_params = [{transform_indices = @transform_0, window_bounds = array<i64: 2, 8, 32>}, {transform_indices = @transform_1, window_bounds = array<i64: 2, 8, 32>}, {transform_indices = @transform_2, window_bounds = array<i64: 2, 8, 32>}, {transform_indices = @transform_3, window_bounds = array<i64: 1, 32, 32>}, {transform_indices = @transform_4, window_bounds = array<i64: 1, 1, 32>}, {transform_indices = @transform_5, window_bounds = array<i64: 1, 32, 32>}, {transform_indices = @transform_6, window_bounds = array<i64: 1, 1, 32>}, {transform_indices = @transform_7, window_bounds = array<i64: 1, 32, 32>}, {transform_indices = @transform_8, window_bounds = array<i64: 1, 1, 32>}, {transform_indices = @transform_9, window_bounds = array<i64: 1, 32, 32>}, {pipeline_mode = #tpu.pipeline_mode<synchronous>, transform_indices = @transform_10, window_bounds = array<i64: 1, 32>}, {transform_indices = @transform_11, window_bounds = array<i64: 2, 8, 32>}, {transform_indices = @transform_12, window_bounds = array<i64: 2, 4, 8, 8>}]} {
    %c0 = arith.constant 0 : index
    %c0_0 = arith.constant 0 : index
    %c0_1 = arith.constant 0 : index
    %0 = vector.load %arg6[%c0, %c0_0, %c0_1] : memref<1x32x32xbf16, #tpu.memory_space<vmem>>, vector<1x32x32xbf16>
    %1 = vector.shape_cast %0 : vector<1x32x32xbf16> to vector<32x32xbf16>
    %c0_2 = arith.constant 0 : index
    %c0_3 = arith.constant 0 : index
    %c0_4 = arith.constant 0 : index
    %2 = vector.load %arg8[%c0_2, %c0_3, %c0_4] : memref<1x32x32xbf16, #tpu.memory_space<vmem>>, vector<1x32x32xbf16>
    %3 = vector.shape_cast %2 : vector<1x32x32xbf16> to vector<32x32xbf16>
    %c0_5 = arith.constant 0 : index
    %c0_6 = arith.constant 0 : index
    %c0_7 = arith.constant 0 : index
    %4 = vector.load %arg10[%c0_5, %c0_6, %c0_7] : memref<1x32x32xbf16, #tpu.memory_space<vmem>>, vector<1x32x32xbf16>
    %5 = vector.shape_cast %4 : vector<1x32x32xbf16> to vector<32x32xbf16>
    %c0_8 = arith.constant 0 : index
    %c0_9 = arith.constant 0 : index
    %c0_10 = arith.constant 0 : index
    %6 = vector.load %arg12[%c0_8, %c0_9, %c0_10] : memref<1x32x32xbf16, #tpu.memory_space<vmem>>, vector<1x32x32xbf16>
    %7 = vector.shape_cast %6 : vector<1x32x32xbf16> to vector<32x32xbf16>
    %c0_11 = arith.constant 0 : index
    %c0_12 = arith.constant 0 : index
    %c0_13 = arith.constant 0 : index
    %8 = vector.load %arg7[%c0_11, %c0_12, %c0_13] : memref<1x1x32xf32, #tpu.memory_space<vmem>>, vector<1x1x32xf32>
    %9 = vector.shape_cast %8 : vector<1x1x32xf32> to vector<1x32xf32>
    %c0_14 = arith.constant 0 : index
    %c0_15 = arith.constant 0 : index
    %c0_16 = arith.constant 0 : index
    %10 = vector.load %arg9[%c0_14, %c0_15, %c0_16] : memref<1x1x32xf32, #tpu.memory_space<vmem>>, vector<1x1x32xf32>
    %11 = vector.shape_cast %10 : vector<1x1x32xf32> to vector<1x32xf32>
    %c0_17 = arith.constant 0 : index
    %c0_18 = arith.constant 0 : index
    %c0_19 = arith.constant 0 : index
    %12 = vector.load %arg11[%c0_17, %c0_18, %c0_19] : memref<1x1x32xf32, #tpu.memory_space<vmem>>, vector<1x1x32xf32>
    %13 = vector.shape_cast %12 : vector<1x1x32xf32> to vector<1x32xf32>
    %c0_i32 = arith.constant 0 : i32
    %14 = arith.cmpi eq, %arg2, %c0_i32 : i32
    %15 = arith.extui %14 : i1 to i32
    %c0_i32_20 = arith.constant 0 : i32
    %16 = arith.cmpi ne, %15, %c0_i32_20 : i32
    scf.if %16 {
      %c0_127 = arith.constant 0 : index
      %c0_128 = arith.constant 0 : index
      %251 = vector.load %arg13[%c0_127, %c0_128] : memref<1x32xf32, #tpu.memory_space<vmem>>, vector<1x32xf32>
      %252 = vector.shape_cast %251 : vector<1x32xf32> to vector<1x1x32xf32>
      %253 = vector.shape_cast %252 : vector<1x1x32xf32> to vector<1x1x32xf32>
      %254 = vector.broadcast %253 : vector<1x1x32xf32> to vector<2x8x32xf32>
      %c0_129 = arith.constant 0 : index
      %c0_130 = arith.constant 0 : index
      %c0_131 = arith.constant 0 : index
      %255 = vector.load %arg14[%c0_129, %c0_130, %c0_131] : memref<2x8x32xf32, #tpu.memory_space<vmem>>, vector<2x8x32xf32>
      tpu.vector_store %arg14[%c0_129, %c0_130, %c0_131], %254 {strides = array<i32>} : memref<2x8x32xf32, #tpu.memory_space<vmem>>, vector<2x8x32xf32>,
    } else {
    }
    %c0_21 = arith.constant 0 : index
    %c0_22 = arith.constant 0 : index
    %c0_23 = arith.constant 0 : index
    %17 = vector.load %arg3[%c0_21, %c0_22, %c0_23] : memref<2x8x32xbf16, #tpu.memory_space<vmem>>, vector<1x8x32xbf16>
    %18 = vector.shape_cast %17 : vector<1x8x32xbf16> to vector<8x32xbf16>
    %cst = arith.constant dense<0.000000e+00> : vector<8x32xf32>
    %19 = tpu.matmul %18, %1, %cst {dimension_numbers = #tpu.dot_dimension_numbers<[1], [0], [0], [1], [0, 0, 1, 1], [], []>} : vector<8x32xbf16>, vector<32x32xbf16>, vector<8x32xf32> -> vector<8x32xf32>
    %20 = vector.broadcast %9 : vector<1x32xf32> to vector<8x32xf32>
    %21 = arith.addf %19, %20 : vector<8x32xf32>
    %22 = arith.truncf %21 : vector<8x32xf32> to vector<8x32xbf16>
    %c0_24 = arith.constant 0 : index
    %c0_25 = arith.constant 0 : index
    %c0_26 = arith.constant 0 : index
    %23 = vector.load %arg4[%c0_24, %c0_25, %c0_26] : memref<2x8x32xbf16, #tpu.memory_space<vmem>>, vector<1x8x32xbf16>
    %24 = vector.shape_cast %23 : vector<1x8x32xbf16> to vector<8x32xbf16>
    %cst_27 = arith.constant dense<0.000000e+00> : vector<8x32xf32>
    %25 = tpu.matmul %24, %3, %cst_27 {dimension_numbers = #tpu.dot_dimension_numbers<[1], [0], [0], [1], [0, 0, 1, 1], [], []>} : vector<8x32xbf16>, vector<32x32xbf16>, vector<8x32xf32> -> vector<8x32xf32>
    %26 = vector.broadcast %11 : vector<1x32xf32> to vector<8x32xf32>
    %27 = arith.addf %25, %26 : vector<8x32xf32>
    %28 = arith.truncf %27 : vector<8x32xf32> to vector<8x32xbf16>
    %c0_28 = arith.constant 0 : index
    %c0_29 = arith.constant 0 : index
    %c0_30 = arith.constant 0 : index
    %29 = vector.load %arg5[%c0_28, %c0_29, %c0_30] : memref<2x8x32xbf16, #tpu.memory_space<vmem>>, vector<1x8x32xbf16>
    %30 = vector.shape_cast %29 : vector<1x8x32xbf16> to vector<8x32xbf16>
    %cst_31 = arith.constant dense<0.000000e+00> : vector<8x32xf32>
    %31 = tpu.matmul %30, %5, %cst_31 {dimension_numbers = #tpu.dot_dimension_numbers<[1], [0], [0], [1], [0, 0, 1, 1], [], []>} : vector<8x32xbf16>, vector<32x32xbf16>, vector<8x32xf32> -> vector<8x32xf32>
    %32 = vector.broadcast %13 : vector<1x32xf32> to vector<8x32xf32>
    %33 = arith.addf %31, %32 : vector<8x32xf32>
    %34 = arith.truncf %33 : vector<8x32xf32> to vector<8x32xbf16>
    %cst_32 = arith.constant 0.000000e+00 : f32
    %35 = vector.broadcast %cst_32 : f32 to vector<8x32xf32>
    %36 = vector.extract_strided_slice %22 {offsets = [0, 0], sizes = [8, 8], strides = [1, 1]} : vector<8x32xbf16> to vector<8x8xbf16>
    %37 = vector.extract_strided_slice %28 {offsets = [0, 0], sizes = [8, 8], strides = [1, 1]} : vector<8x32xbf16> to vector<8x8xbf16>
    %cst_33 = arith.constant dense<0.000000e+00> : vector<8x8xf32>
    %38 = tpu.matmul %36, %37, %cst_33 {dimension_numbers = #tpu.dot_dimension_numbers<[1], [1], [0], [0], [0, 0, 1, 0], [], []>} : vector<8x8xbf16>, vector<8x8xbf16>, vector<8x8xf32> -> vector<8x8xf32>
    %cst_34 = arith.constant dense<0xFF800000> : vector<8xf32>
    %39 = vector.multi_reduction <maximumf>, %38, %cst_34 [1] : vector<8x8xf32> to vector<8xf32>
    %40 = vector.shape_cast %39 : vector<8xf32> to vector<8x1xf32>
    %41 = vector.broadcast %40 : vector<8x1xf32> to vector<8x8xf32>
    %42 = arith.subf %38, %41 : vector<8x8xf32>
    %43 = math.exp %42 : vector<8x8xf32>
    %cst_35 = arith.constant dense<0.000000e+00> : vector<8xf32>
    %44 = vector.multi_reduction <add>, %43, %cst_35 [1] : vector<8x8xf32> to vector<8xf32>
    %45 = vector.shape_cast %44 : vector<8xf32> to vector<8x1xf32>
    %46 = tpu.reciprocal %45 {approx = true} : vector<8x1xf32> -> vector<8x1xf32>
    %47 = vector.broadcast %46 : vector<8x1xf32> to vector<8x8xf32>
    %48 = arith.mulf %43, %47 : vector<8x8xf32>
    %49 = arith.truncf %48 : vector<8x8xf32> to vector<8x8xbf16>
    %c0_36 = arith.constant 0 : index
    %c0_37 = arith.constant 0 : index
    %c0_38 = arith.constant 0 : index
    %c0_39 = arith.constant 0 : index
    %50 = vector.load %arg15[%c0_36, %c0_37, %c0_38, %c0_39] : memref<2x4x8x8xbf16, #tpu.memory_space<vmem>>, vector<1x1x8x8xbf16>
    %51 = vector.shape_cast %50 : vector<1x1x8x8xbf16> to vector<8x8xbf16>
    %52 = vector.shape_cast %49 : vector<8x8xbf16> to vector<1x1x8x8xbf16>
    tpu.vector_store %arg15[%c0_36, %c0_37, %c0_38, %c0_39], %52 {strides = array<i32>} : memref<2x4x8x8xbf16, #tpu.memory_space<vmem>>, vector<1x1x8x8xbf16>,
    %53 = vector.extract_strided_slice %34 {offsets = [0, 0], sizes = [8, 8], strides = [1, 1]} : vector<8x32xbf16> to vector<8x8xbf16>
    %cst_40 = arith.constant dense<0.000000e+00> : vector<8x8xf32>
    %54 = tpu.matmul %49, %53, %cst_40 {dimension_numbers = #tpu.dot_dimension_numbers<[1], [0], [0], [1], [0, 0, 1, 1], [], []>} : vector<8x8xbf16>, vector<8x8xbf16>, vector<8x8xf32> -> vector<8x8xf32>
    %55 = arith.truncf %54 : vector<8x8xf32> to vector<8x8xbf16>
    %56 = vector.extract_strided_slice %7 {offsets = [0, 0], sizes = [8, 32], strides = [1, 1]} : vector<32x32xbf16> to vector<8x32xbf16>
    %cst_41 = arith.constant dense<0.000000e+00> : vector<8x32xf32>
    %57 = tpu.matmul %55, %56, %cst_41 {dimension_numbers = #tpu.dot_dimension_numbers<[1], [0], [0], [1], [0, 0, 1, 1], [], []>} : vector<8x8xbf16>, vector<8x32xbf16>, vector<8x32xf32> -> vector<8x32xf32>
    %58 = arith.addf %35, %57 : vector<8x32xf32>
    %59 = vector.extract_strided_slice %22 {offsets = [0, 8], sizes = [8, 8], strides = [1, 1]} : vector<8x32xbf16> to vector<8x8xbf16>
    %60 = vector.extract_strided_slice %28 {offsets = [0, 8], sizes = [8, 8], strides = [1, 1]} : vector<8x32xbf16> to vector<8x8xbf16>
    %cst_42 = arith.constant dense<0.000000e+00> : vector<8x8xf32>
    %61 = tpu.matmul %59, %60, %cst_42 {dimension_numbers = #tpu.dot_dimension_numbers<[1], [1], [0], [0], [0, 0, 1, 0], [], []>} : vector<8x8xbf16>, vector<8x8xbf16>, vector<8x8xf32> -> vector<8x8xf32>
    %cst_43 = arith.constant dense<0xFF800000> : vector<8xf32>
    %62 = vector.multi_reduction <maximumf>, %61, %cst_43 [1] : vector<8x8xf32> to vector<8xf32>
    %63 = vector.shape_cast %62 : vector<8xf32> to vector<8x1xf32>
    %64 = vector.broadcast %63 : vector<8x1xf32> to vector<8x8xf32>
    %65 = arith.subf %61, %64 : vector<8x8xf32>
    %66 = math.exp %65 : vector<8x8xf32>
    %cst_44 = arith.constant dense<0.000000e+00> : vector<8xf32>
    %67 = vector.multi_reduction <add>, %66, %cst_44 [1] : vector<8x8xf32> to vector<8xf32>
    %68 = vector.shape_cast %67 : vector<8xf32> to vector<8x1xf32>
    %69 = tpu.reciprocal %68 {approx = true} : vector<8x1xf32> -> vector<8x1xf32>
    %70 = vector.broadcast %69 : vector<8x1xf32> to vector<8x8xf32>
    %71 = arith.mulf %66, %70 : vector<8x8xf32>
    %72 = arith.truncf %71 : vector<8x8xf32> to vector<8x8xbf16>
    %c0_45 = arith.constant 0 : index
    %c1 = arith.constant 1 : index
    %c0_46 = arith.constant 0 : index
    %c0_47 = arith.constant 0 : index
    %73 = vector.load %arg15[%c0_45, %c1, %c0_46, %c0_47] : memref<2x4x8x8xbf16, #tpu.memory_space<vmem>>, vector<1x1x8x8xbf16>
    %74 = vector.shape_cast %73 : vector<1x1x8x8xbf16> to vector<8x8xbf16>
    %75 = vector.shape_cast %72 : vector<8x8xbf16> to vector<1x1x8x8xbf16>
    tpu.vector_store %arg15[%c0_45, %c1, %c0_46, %c0_47], %75 {strides = array<i32>} : memref<2x4x8x8xbf16, #tpu.memory_space<vmem>>, vector<1x1x8x8xbf16>,
    %76 = vector.extract_strided_slice %34 {offsets = [0, 8], sizes = [8, 8], strides = [1, 1]} : vector<8x32xbf16> to vector<8x8xbf16>
    %cst_48 = arith.constant dense<0.000000e+00> : vector<8x8xf32>
    %77 = tpu.matmul %72, %76, %cst_48 {dimension_numbers = #tpu.dot_dimension_numbers<[1], [0], [0], [1], [0, 0, 1, 1], [], []>} : vector<8x8xbf16>, vector<8x8xbf16>, vector<8x8xf32> -> vector<8x8xf32>
    %78 = arith.truncf %77 : vector<8x8xf32> to vector<8x8xbf16>
    %79 = vector.extract_strided_slice %7 {offsets = [8, 0], sizes = [8, 32], strides = [1, 1]} : vector<32x32xbf16> to vector<8x32xbf16>
    %cst_49 = arith.constant dense<0.000000e+00> : vector<8x32xf32>
    %80 = tpu.matmul %78, %79, %cst_49 {dimension_numbers = #tpu.dot_dimension_numbers<[1], [0], [0], [1], [0, 0, 1, 1], [], []>} : vector<8x8xbf16>, vector<8x32xbf16>, vector<8x32xf32> -> vector<8x32xf32>
    %81 = arith.addf %58, %80 : vector<8x32xf32>
    %82 = vector.extract_strided_slice %22 {offsets = [0, 16], sizes = [8, 8], strides = [1, 1]} : vector<8x32xbf16> to vector<8x8xbf16>
    %83 = vector.extract_strided_slice %28 {offsets = [0, 16], sizes = [8, 8], strides = [1, 1]} : vector<8x32xbf16> to vector<8x8xbf16>
    %cst_50 = arith.constant dense<0.000000e+00> : vector<8x8xf32>
    %84 = tpu.matmul %82, %83, %cst_50 {dimension_numbers = #tpu.dot_dimension_numbers<[1], [1], [0], [0], [0, 0, 1, 0], [], []>} : vector<8x8xbf16>, vector<8x8xbf16>, vector<8x8xf32> -> vector<8x8xf32>
    %cst_51 = arith.constant dense<0xFF800000> : vector<8xf32>
    %85 = vector.multi_reduction <maximumf>, %84, %cst_51 [1] : vector<8x8xf32> to vector<8xf32>
    %86 = vector.shape_cast %85 : vector<8xf32> to vector<8x1xf32>
    %87 = vector.broadcast %86 : vector<8x1xf32> to vector<8x8xf32>
    %88 = arith.subf %84, %87 : vector<8x8xf32>
    %89 = math.exp %88 : vector<8x8xf32>
    %cst_52 = arith.constant dense<0.000000e+00> : vector<8xf32>
    %90 = vector.multi_reduction <add>, %89, %cst_52 [1] : vector<8x8xf32> to vector<8xf32>
    %91 = vector.shape_cast %90 : vector<8xf32> to vector<8x1xf32>
    %92 = tpu.reciprocal %91 {approx = true} : vector<8x1xf32> -> vector<8x1xf32>
    %93 = vector.broadcast %92 : vector<8x1xf32> to vector<8x8xf32>
    %94 = arith.mulf %89, %93 : vector<8x8xf32>
    %95 = arith.truncf %94 : vector<8x8xf32> to vector<8x8xbf16>
    %c0_53 = arith.constant 0 : index
    %c2 = arith.constant 2 : index
    %c0_54 = arith.constant 0 : index
    %c0_55 = arith.constant 0 : index
    %96 = vector.load %arg15[%c0_53, %c2, %c0_54, %c0_55] : memref<2x4x8x8xbf16, #tpu.memory_space<vmem>>, vector<1x1x8x8xbf16>
    %97 = vector.shape_cast %96 : vector<1x1x8x8xbf16> to vector<8x8xbf16>
    %98 = vector.shape_cast %95 : vector<8x8xbf16> to vector<1x1x8x8xbf16>
    tpu.vector_store %arg15[%c0_53, %c2, %c0_54, %c0_55], %98 {strides = array<i32>} : memref<2x4x8x8xbf16, #tpu.memory_space<vmem>>, vector<1x1x8x8xbf16>,
    %99 = vector.extract_strided_slice %34 {offsets = [0, 16], sizes = [8, 8], strides = [1, 1]} : vector<8x32xbf16> to vector<8x8xbf16>
    %cst_56 = arith.constant dense<0.000000e+00> : vector<8x8xf32>
    %100 = tpu.matmul %95, %99, %cst_56 {dimension_numbers = #tpu.dot_dimension_numbers<[1], [0], [0], [1], [0, 0, 1, 1], [], []>} : vector<8x8xbf16>, vector<8x8xbf16>, vector<8x8xf32> -> vector<8x8xf32>
    %101 = arith.truncf %100 : vector<8x8xf32> to vector<8x8xbf16>
    %102 = vector.extract_strided_slice %7 {offsets = [16, 0], sizes = [8, 32], strides = [1, 1]} : vector<32x32xbf16> to vector<8x32xbf16>
    %cst_57 = arith.constant dense<0.000000e+00> : vector<8x32xf32>
    %103 = tpu.matmul %101, %102, %cst_57 {dimension_numbers = #tpu.dot_dimension_numbers<[1], [0], [0], [1], [0, 0, 1, 1], [], []>} : vector<8x8xbf16>, vector<8x32xbf16>, vector<8x32xf32> -> vector<8x32xf32>
    %104 = arith.addf %81, %103 : vector<8x32xf32>
    %105 = vector.extract_strided_slice %22 {offsets = [0, 24], sizes = [8, 8], strides = [1, 1]} : vector<8x32xbf16> to vector<8x8xbf16>
    %106 = vector.extract_strided_slice %28 {offsets = [0, 24], sizes = [8, 8], strides = [1, 1]} : vector<8x32xbf16> to vector<8x8xbf16>
    %cst_58 = arith.constant dense<0.000000e+00> : vector<8x8xf32>
    %107 = tpu.matmul %105, %106, %cst_58 {dimension_numbers = #tpu.dot_dimension_numbers<[1], [1], [0], [0], [0, 0, 1, 0], [], []>} : vector<8x8xbf16>, vector<8x8xbf16>, vector<8x8xf32> -> vector<8x8xf32>
    %cst_59 = arith.constant dense<0xFF800000> : vector<8xf32>
    %108 = vector.multi_reduction <maximumf>, %107, %cst_59 [1] : vector<8x8xf32> to vector<8xf32>
    %109 = vector.shape_cast %108 : vector<8xf32> to vector<8x1xf32>
    %110 = vector.broadcast %109 : vector<8x1xf32> to vector<8x8xf32>
    %111 = arith.subf %107, %110 : vector<8x8xf32>
    %112 = math.exp %111 : vector<8x8xf32>
    %cst_60 = arith.constant dense<0.000000e+00> : vector<8xf32>
    %113 = vector.multi_reduction <add>, %112, %cst_60 [1] : vector<8x8xf32> to vector<8xf32>
    %114 = vector.shape_cast %113 : vector<8xf32> to vector<8x1xf32>
    %115 = tpu.reciprocal %114 {approx = true} : vector<8x1xf32> -> vector<8x1xf32>
    %116 = vector.broadcast %115 : vector<8x1xf32> to vector<8x8xf32>
    %117 = arith.mulf %112, %116 : vector<8x8xf32>
    %118 = arith.truncf %117 : vector<8x8xf32> to vector<8x8xbf16>
    %c0_61 = arith.constant 0 : index
    %c3 = arith.constant 3 : index
    %c0_62 = arith.constant 0 : index
    %c0_63 = arith.constant 0 : index
    %119 = vector.load %arg15[%c0_61, %c3, %c0_62, %c0_63] : memref<2x4x8x8xbf16, #tpu.memory_space<vmem>>, vector<1x1x8x8xbf16>
    %120 = vector.shape_cast %119 : vector<1x1x8x8xbf16> to vector<8x8xbf16>
    %121 = vector.shape_cast %118 : vector<8x8xbf16> to vector<1x1x8x8xbf16>
    tpu.vector_store %arg15[%c0_61, %c3, %c0_62, %c0_63], %121 {strides = array<i32>} : memref<2x4x8x8xbf16, #tpu.memory_space<vmem>>, vector<1x1x8x8xbf16>,
    %122 = vector.extract_strided_slice %34 {offsets = [0, 24], sizes = [8, 8], strides = [1, 1]} : vector<8x32xbf16> to vector<8x8xbf16>
    %cst_64 = arith.constant dense<0.000000e+00> : vector<8x8xf32>
    %123 = tpu.matmul %118, %122, %cst_64 {dimension_numbers = #tpu.dot_dimension_numbers<[1], [0], [0], [1], [0, 0, 1, 1], [], []>} : vector<8x8xbf16>, vector<8x8xbf16>, vector<8x8xf32> -> vector<8x8xf32>
    %124 = arith.truncf %123 : vector<8x8xf32> to vector<8x8xbf16>
    %125 = vector.extract_strided_slice %7 {offsets = [24, 0], sizes = [8, 32], strides = [1, 1]} : vector<32x32xbf16> to vector<8x32xbf16>
    %cst_65 = arith.constant dense<0.000000e+00> : vector<8x32xf32>
    %126 = tpu.matmul %124, %125, %cst_65 {dimension_numbers = #tpu.dot_dimension_numbers<[1], [0], [0], [1], [0, 0, 1, 1], [], []>} : vector<8x8xbf16>, vector<8x32xbf16>, vector<8x32xf32> -> vector<8x32xf32>
    %127 = arith.addf %104, %126 : vector<8x32xf32>
    %c0_66 = arith.constant 0 : index
    %c0_67 = arith.constant 0 : index
    %c0_68 = arith.constant 0 : index
    %128 = vector.load %arg14[%c0_66, %c0_67, %c0_68] : memref<2x8x32xf32, #tpu.memory_space<vmem>>, vector<1x8x32xf32>
    %129 = vector.shape_cast %128 : vector<1x8x32xf32> to vector<8x32xf32>
    %130 = arith.addf %129, %127 : vector<8x32xf32>
    %c0_69 = arith.constant 0 : index
    %c0_70 = arith.constant 0 : index
    %c0_71 = arith.constant 0 : index
    %131 = vector.load %arg14[%c0_69, %c0_70, %c0_71] : memref<2x8x32xf32, #tpu.memory_space<vmem>>, vector<1x8x32xf32>
    %132 = vector.shape_cast %131 : vector<1x8x32xf32> to vector<8x32xf32>
    %133 = vector.shape_cast %130 : vector<8x32xf32> to vector<1x8x32xf32>
    tpu.vector_store %arg14[%c0_69, %c0_70, %c0_71], %133 {strides = array<i32>} : memref<2x8x32xf32, #tpu.memory_space<vmem>>, vector<1x8x32xf32>,
    %c1_72 = arith.constant 1 : index
    %c0_73 = arith.constant 0 : index
    %c0_74 = arith.constant 0 : index
    %134 = vector.load %arg3[%c1_72, %c0_73, %c0_74] : memref<2x8x32xbf16, #tpu.memory_space<vmem>>, vector<1x8x32xbf16>
    %135 = vector.shape_cast %134 : vector<1x8x32xbf16> to vector<8x32xbf16>
    %cst_75 = arith.constant dense<0.000000e+00> : vector<8x32xf32>
    %136 = tpu.matmul %135, %1, %cst_75 {dimension_numbers = #tpu.dot_dimension_numbers<[1], [0], [0], [1], [0, 0, 1, 1], [], []>} : vector<8x32xbf16>, vector<32x32xbf16>, vector<8x32xf32> -> vector<8x32xf32>
    %137 = vector.broadcast %9 : vector<1x32xf32> to vector<8x32xf32>
    %138 = arith.addf %136, %137 : vector<8x32xf32>
    %139 = arith.truncf %138 : vector<8x32xf32> to vector<8x32xbf16>
    %c1_76 = arith.constant 1 : index
    %c0_77 = arith.constant 0 : index
    %c0_78 = arith.constant 0 : index
    %140 = vector.load %arg4[%c1_76, %c0_77, %c0_78] : memref<2x8x32xbf16, #tpu.memory_space<vmem>>, vector<1x8x32xbf16>
    %141 = vector.shape_cast %140 : vector<1x8x32xbf16> to vector<8x32xbf16>
    %cst_79 = arith.constant dense<0.000000e+00> : vector<8x32xf32>
    %142 = tpu.matmul %141, %3, %cst_79 {dimension_numbers = #tpu.dot_dimension_numbers<[1], [0], [0], [1], [0, 0, 1, 1], [], []>} : vector<8x32xbf16>, vector<32x32xbf16>, vector<8x32xf32> -> vector<8x32xf32>
    %143 = vector.broadcast %11 : vector<1x32xf32> to vector<8x32xf32>
    %144 = arith.addf %142, %143 : vector<8x32xf32>
    %145 = arith.truncf %144 : vector<8x32xf32> to vector<8x32xbf16>
    %c1_80 = arith.constant 1 : index
    %c0_81 = arith.constant 0 : index
    %c0_82 = arith.constant 0 : index
    %146 = vector.load %arg5[%c1_80, %c0_81, %c0_82] : memref<2x8x32xbf16, #tpu.memory_space<vmem>>, vector<1x8x32xbf16>
    %147 = vector.shape_cast %146 : vector<1x8x32xbf16> to vector<8x32xbf16>
    %cst_83 = arith.constant dense<0.000000e+00> : vector<8x32xf32>
    %148 = tpu.matmul %147, %5, %cst_83 {dimension_numbers = #tpu.dot_dimension_numbers<[1], [0], [0], [1], [0, 0, 1, 1], [], []>} : vector<8x32xbf16>, vector<32x32xbf16>, vector<8x32xf32> -> vector<8x32xf32>
    %149 = vector.broadcast %13 : vector<1x32xf32> to vector<8x32xf32>
    %150 = arith.addf %148, %149 : vector<8x32xf32>
    %151 = arith.truncf %150 : vector<8x32xf32> to vector<8x32xbf16>
    %cst_84 = arith.constant 0.000000e+00 : f32
    %152 = vector.broadcast %cst_84 : f32 to vector<8x32xf32>
    %153 = vector.extract_strided_slice %139 {offsets = [0, 0], sizes = [8, 8], strides = [1, 1]} : vector<8x32xbf16> to vector<8x8xbf16>
    %154 = vector.extract_strided_slice %145 {offsets = [0, 0], sizes = [8, 8], strides = [1, 1]} : vector<8x32xbf16> to vector<8x8xbf16>
    %cst_85 = arith.constant dense<0.000000e+00> : vector<8x8xf32>
    %155 = tpu.matmul %153, %154, %cst_85 {dimension_numbers = #tpu.dot_dimension_numbers<[1], [1], [0], [0], [0, 0, 1, 0], [], []>} : vector<8x8xbf16>, vector<8x8xbf16>, vector<8x8xf32> -> vector<8x8xf32>
    %cst_86 = arith.constant dense<0xFF800000> : vector<8xf32>
    %156 = vector.multi_reduction <maximumf>, %155, %cst_86 [1] : vector<8x8xf32> to vector<8xf32>
    %157 = vector.shape_cast %156 : vector<8xf32> to vector<8x1xf32>
    %158 = vector.broadcast %157 : vector<8x1xf32> to vector<8x8xf32>
    %159 = arith.subf %155, %158 : vector<8x8xf32>
    %160 = math.exp %159 : vector<8x8xf32>
    %cst_87 = arith.constant dense<0.000000e+00> : vector<8xf32>
    %161 = vector.multi_reduction <add>, %160, %cst_87 [1] : vector<8x8xf32> to vector<8xf32>
    %162 = vector.shape_cast %161 : vector<8xf32> to vector<8x1xf32>
    %163 = tpu.reciprocal %162 {approx = true} : vector<8x1xf32> -> vector<8x1xf32>
    %164 = vector.broadcast %163 : vector<8x1xf32> to vector<8x8xf32>
    %165 = arith.mulf %160, %164 : vector<8x8xf32>
    %166 = arith.truncf %165 : vector<8x8xf32> to vector<8x8xbf16>
    %c1_88 = arith.constant 1 : index
    %c0_89 = arith.constant 0 : index
    %c0_90 = arith.constant 0 : index
    %c0_91 = arith.constant 0 : index
    %167 = vector.load %arg15[%c1_88, %c0_89, %c0_90, %c0_91] : memref<2x4x8x8xbf16, #tpu.memory_space<vmem>>, vector<1x1x8x8xbf16>
    %168 = vector.shape_cast %167 : vector<1x1x8x8xbf16> to vector<8x8xbf16>
    %169 = vector.shape_cast %166 : vector<8x8xbf16> to vector<1x1x8x8xbf16>
    tpu.vector_store %arg15[%c1_88, %c0_89, %c0_90, %c0_91], %169 {strides = array<i32>} : memref<2x4x8x8xbf16, #tpu.memory_space<vmem>>, vector<1x1x8x8xbf16>,
    %170 = vector.extract_strided_slice %151 {offsets = [0, 0], sizes = [8, 8], strides = [1, 1]} : vector<8x32xbf16> to vector<8x8xbf16>
    %cst_92 = arith.constant dense<0.000000e+00> : vector<8x8xf32>
    %171 = tpu.matmul %166, %170, %cst_92 {dimension_numbers = #tpu.dot_dimension_numbers<[1], [0], [0], [1], [0, 0, 1, 1], [], []>} : vector<8x8xbf16>, vector<8x8xbf16>, vector<8x8xf32> -> vector<8x8xf32>
    %172 = arith.truncf %171 : vector<8x8xf32> to vector<8x8xbf16>
    %173 = vector.extract_strided_slice %7 {offsets = [0, 0], sizes = [8, 32], strides = [1, 1]} : vector<32x32xbf16> to vector<8x32xbf16>
    %cst_93 = arith.constant dense<0.000000e+00> : vector<8x32xf32>
    %174 = tpu.matmul %172, %173, %cst_93 {dimension_numbers = #tpu.dot_dimension_numbers<[1], [0], [0], [1], [0, 0, 1, 1], [], []>} : vector<8x8xbf16>, vector<8x32xbf16>, vector<8x32xf32> -> vector<8x32xf32>
    %175 = arith.addf %152, %174 : vector<8x32xf32>
    %176 = vector.extract_strided_slice %139 {offsets = [0, 8], sizes = [8, 8], strides = [1, 1]} : vector<8x32xbf16> to vector<8x8xbf16>
    %177 = vector.extract_strided_slice %145 {offsets = [0, 8], sizes = [8, 8], strides = [1, 1]} : vector<8x32xbf16> to vector<8x8xbf16>
    %cst_94 = arith.constant dense<0.000000e+00> : vector<8x8xf32>
    %178 = tpu.matmul %176, %177, %cst_94 {dimension_numbers = #tpu.dot_dimension_numbers<[1], [1], [0], [0], [0, 0, 1, 0], [], []>} : vector<8x8xbf16>, vector<8x8xbf16>, vector<8x8xf32> -> vector<8x8xf32>
    %cst_95 = arith.constant dense<0xFF800000> : vector<8xf32>
    %179 = vector.multi_reduction <maximumf>, %178, %cst_95 [1] : vector<8x8xf32> to vector<8xf32>
    %180 = vector.shape_cast %179 : vector<8xf32> to vector<8x1xf32>
    %181 = vector.broadcast %180 : vector<8x1xf32> to vector<8x8xf32>
    %182 = arith.subf %178, %181 : vector<8x8xf32>
    %183 = math.exp %182 : vector<8x8xf32>
    %cst_96 = arith.constant dense<0.000000e+00> : vector<8xf32>
    %184 = vector.multi_reduction <add>, %183, %cst_96 [1] : vector<8x8xf32> to vector<8xf32>
    %185 = vector.shape_cast %184 : vector<8xf32> to vector<8x1xf32>
    %186 = tpu.reciprocal %185 {approx = true} : vector<8x1xf32> -> vector<8x1xf32>
    %187 = vector.broadcast %186 : vector<8x1xf32> to vector<8x8xf32>
    %188 = arith.mulf %183, %187 : vector<8x8xf32>
    %189 = arith.truncf %188 : vector<8x8xf32> to vector<8x8xbf16>
    %c1_97 = arith.constant 1 : index
    %c1_98 = arith.constant 1 : index
    %c0_99 = arith.constant 0 : index
    %c0_100 = arith.constant 0 : index
    %190 = vector.load %arg15[%c1_97, %c1_98, %c0_99, %c0_100] : memref<2x4x8x8xbf16, #tpu.memory_space<vmem>>, vector<1x1x8x8xbf16>
    %191 = vector.shape_cast %190 : vector<1x1x8x8xbf16> to vector<8x8xbf16>
    %192 = vector.shape_cast %189 : vector<8x8xbf16> to vector<1x1x8x8xbf16>
    tpu.vector_store %arg15[%c1_97, %c1_98, %c0_99, %c0_100], %192 {strides = array<i32>} : memref<2x4x8x8xbf16, #tpu.memory_space<vmem>>, vector<1x1x8x8xbf16>,
    %193 = vector.extract_strided_slice %151 {offsets = [0, 8], sizes = [8, 8], strides = [1, 1]} : vector<8x32xbf16> to vector<8x8xbf16>
    %cst_101 = arith.constant dense<0.000000e+00> : vector<8x8xf32>
    %194 = tpu.matmul %189, %193, %cst_101 {dimension_numbers = #tpu.dot_dimension_numbers<[1], [0], [0], [1], [0, 0, 1, 1], [], []>} : vector<8x8xbf16>, vector<8x8xbf16>, vector<8x8xf32> -> vector<8x8xf32>
    %195 = arith.truncf %194 : vector<8x8xf32> to vector<8x8xbf16>
    %196 = vector.extract_strided_slice %7 {offsets = [8, 0], sizes = [8, 32], strides = [1, 1]} : vector<32x32xbf16> to vector<8x32xbf16>
    %cst_102 = arith.constant dense<0.000000e+00> : vector<8x32xf32>
    %197 = tpu.matmul %195, %196, %cst_102 {dimension_numbers = #tpu.dot_dimension_numbers<[1], [0], [0], [1], [0, 0, 1, 1], [], []>} : vector<8x8xbf16>, vector<8x32xbf16>, vector<8x32xf32> -> vector<8x32xf32>
    %198 = arith.addf %175, %197 : vector<8x32xf32>
    %199 = vector.extract_strided_slice %139 {offsets = [0, 16], sizes = [8, 8], strides = [1, 1]} : vector<8x32xbf16> to vector<8x8xbf16>
    %200 = vector.extract_strided_slice %145 {offsets = [0, 16], sizes = [8, 8], strides = [1, 1]} : vector<8x32xbf16> to vector<8x8xbf16>
    %cst_103 = arith.constant dense<0.000000e+00> : vector<8x8xf32>
    %201 = tpu.matmul %199, %200, %cst_103 {dimension_numbers = #tpu.dot_dimension_numbers<[1], [1], [0], [0], [0, 0, 1, 0], [], []>} : vector<8x8xbf16>, vector<8x8xbf16>, vector<8x8xf32> -> vector<8x8xf32>
    %cst_104 = arith.constant dense<0xFF800000> : vector<8xf32>
    %202 = vector.multi_reduction <maximumf>, %201, %cst_104 [1] : vector<8x8xf32> to vector<8xf32>
    %203 = vector.shape_cast %202 : vector<8xf32> to vector<8x1xf32>
    %204 = vector.broadcast %203 : vector<8x1xf32> to vector<8x8xf32>
    %205 = arith.subf %201, %204 : vector<8x8xf32>
    %206 = math.exp %205 : vector<8x8xf32>
    %cst_105 = arith.constant dense<0.000000e+00> : vector<8xf32>
    %207 = vector.multi_reduction <add>, %206, %cst_105 [1] : vector<8x8xf32> to vector<8xf32>
    %208 = vector.shape_cast %207 : vector<8xf32> to vector<8x1xf32>
    %209 = tpu.reciprocal %208 {approx = true} : vector<8x1xf32> -> vector<8x1xf32>
    %210 = vector.broadcast %209 : vector<8x1xf32> to vector<8x8xf32>
    %211 = arith.mulf %206, %210 : vector<8x8xf32>
    %212 = arith.truncf %211 : vector<8x8xf32> to vector<8x8xbf16>
    %c1_106 = arith.constant 1 : index
    %c2_107 = arith.constant 2 : index
    %c0_108 = arith.constant 0 : index
    %c0_109 = arith.constant 0 : index
    %213 = vector.load %arg15[%c1_106, %c2_107, %c0_108, %c0_109] : memref<2x4x8x8xbf16, #tpu.memory_space<vmem>>, vector<1x1x8x8xbf16>
    %214 = vector.shape_cast %213 : vector<1x1x8x8xbf16> to vector<8x8xbf16>
    %215 = vector.shape_cast %212 : vector<8x8xbf16> to vector<1x1x8x8xbf16>
    tpu.vector_store %arg15[%c1_106, %c2_107, %c0_108, %c0_109], %215 {strides = array<i32>} : memref<2x4x8x8xbf16, #tpu.memory_space<vmem>>, vector<1x1x8x8xbf16>,
    %216 = vector.extract_strided_slice %151 {offsets = [0, 16], sizes = [8, 8], strides = [1, 1]} : vector<8x32xbf16> to vector<8x8xbf16>
    %cst_110 = arith.constant dense<0.000000e+00> : vector<8x8xf32>
    %217 = tpu.matmul %212, %216, %cst_110 {dimension_numbers = #tpu.dot_dimension_numbers<[1], [0], [0], [1], [0, 0, 1, 1], [], []>} : vector<8x8xbf16>, vector<8x8xbf16>, vector<8x8xf32> -> vector<8x8xf32>
    %218 = arith.truncf %217 : vector<8x8xf32> to vector<8x8xbf16>
    %219 = vector.extract_strided_slice %7 {offsets = [16, 0], sizes = [8, 32], strides = [1, 1]} : vector<32x32xbf16> to vector<8x32xbf16>
    %cst_111 = arith.constant dense<0.000000e+00> : vector<8x32xf32>
    %220 = tpu.matmul %218, %219, %cst_111 {dimension_numbers = #tpu.dot_dimension_numbers<[1], [0], [0], [1], [0, 0, 1, 1], [], []>} : vector<8x8xbf16>, vector<8x32xbf16>, vector<8x32xf32> -> vector<8x32xf32>
    %221 = arith.addf %198, %220 : vector<8x32xf32>
    %222 = vector.extract_strided_slice %139 {offsets = [0, 24], sizes = [8, 8], strides = [1, 1]} : vector<8x32xbf16> to vector<8x8xbf16>
    %223 = vector.extract_strided_slice %145 {offsets = [0, 24], sizes = [8, 8], strides = [1, 1]} : vector<8x32xbf16> to vector<8x8xbf16>
    %cst_112 = arith.constant dense<0.000000e+00> : vector<8x8xf32>
    %224 = tpu.matmul %222, %223, %cst_112 {dimension_numbers = #tpu.dot_dimension_numbers<[1], [1], [0], [0], [0, 0, 1, 0], [], []>} : vector<8x8xbf16>, vector<8x8xbf16>, vector<8x8xf32> -> vector<8x8xf32>
    %cst_113 = arith.constant dense<0xFF800000> : vector<8xf32>
    %225 = vector.multi_reduction <maximumf>, %224, %cst_113 [1] : vector<8x8xf32> to vector<8xf32>
    %226 = vector.shape_cast %225 : vector<8xf32> to vector<8x1xf32>
    %227 = vector.broadcast %226 : vector<8x1xf32> to vector<8x8xf32>
    %228 = arith.subf %224, %227 : vector<8x8xf32>
    %229 = math.exp %228 : vector<8x8xf32>
    %cst_114 = arith.constant dense<0.000000e+00> : vector<8xf32>
    %230 = vector.multi_reduction <add>, %229, %cst_114 [1] : vector<8x8xf32> to vector<8xf32>
    %231 = vector.shape_cast %230 : vector<8xf32> to vector<8x1xf32>
    %232 = tpu.reciprocal %231 {approx = true} : vector<8x1xf32> -> vector<8x1xf32>
    %233 = vector.broadcast %232 : vector<8x1xf32> to vector<8x8xf32>
    %234 = arith.mulf %229, %233 : vector<8x8xf32>
    %235 = arith.truncf %234 : vector<8x8xf32> to vector<8x8xbf16>
    %c1_115 = arith.constant 1 : index
    %c3_116 = arith.constant 3 : index
    %c0_117 = arith.constant 0 : index
    %c0_118 = arith.constant 0 : index
    %236 = vector.load %arg15[%c1_115, %c3_116, %c0_117, %c0_118] : memref<2x4x8x8xbf16, #tpu.memory_space<vmem>>, vector<1x1x8x8xbf16>
    %237 = vector.shape_cast %236 : vector<1x1x8x8xbf16> to vector<8x8xbf16>
    %238 = vector.shape_cast %235 : vector<8x8xbf16> to vector<1x1x8x8xbf16>
    tpu.vector_store %arg15[%c1_115, %c3_116, %c0_117, %c0_118], %238 {strides = array<i32>} : memref<2x4x8x8xbf16, #tpu.memory_space<vmem>>, vector<1x1x8x8xbf16>,
    %239 = vector.extract_strided_slice %151 {offsets = [0, 24], sizes = [8, 8], strides = [1, 1]} : vector<8x32xbf16> to vector<8x8xbf16>
    %cst_119 = arith.constant dense<0.000000e+00> : vector<8x8xf32>
    %240 = tpu.matmul %235, %239, %cst_119 {dimension_numbers = #tpu.dot_dimension_numbers<[1], [0], [0], [1], [0, 0, 1, 1], [], []>} : vector<8x8xbf16>, vector<8x8xbf16>, vector<8x8xf32> -> vector<8x8xf32>
    %241 = arith.truncf %240 : vector<8x8xf32> to vector<8x8xbf16>
    %242 = vector.extract_strided_slice %7 {offsets = [24, 0], sizes = [8, 32], strides = [1, 1]} : vector<32x32xbf16> to vector<8x32xbf16>
    %cst_120 = arith.constant dense<0.000000e+00> : vector<8x32xf32>
    %243 = tpu.matmul %241, %242, %cst_120 {dimension_numbers = #tpu.dot_dimension_numbers<[1], [0], [0], [1], [0, 0, 1, 1], [], []>} : vector<8x8xbf16>, vector<8x32xbf16>, vector<8x32xf32> -> vector<8x32xf32>
    %244 = arith.addf %221, %243 : vector<8x32xf32>
    %c1_121 = arith.constant 1 : index
    %c0_122 = arith.constant 0 : index
    %c0_123 = arith.constant 0 : index
    %245 = vector.load %arg14[%c1_121, %c0_122, %c0_123] : memref<2x8x32xf32, #tpu.memory_space<vmem>>, vector<1x8x32xf32>
    %246 = vector.shape_cast %245 : vector<1x8x32xf32> to vector<8x32xf32>
    %247 = arith.addf %246, %244 : vector<8x32xf32>
    %c1_124 = arith.constant 1 : index
    %c0_125 = arith.constant 0 : index
    %c0_126 = arith.constant 0 : index
    %248 = vector.load %arg14[%c1_124, %c0_125, %c0_126] : memref<2x8x32xf32, #tpu.memory_space<vmem>>, vector<1x8x32xf32>
    %249 = vector.shape_cast %248 : vector<1x8x32xf32> to vector<8x32xf32>
    %250 = vector.shape_cast %247 : vector<8x32xf32> to vector<1x8x32xf32>
    tpu.vector_store %arg14[%c1_124, %c0_125, %c0_126], %250 {strides = array<i32>} : memref<2x8x32xf32, #tpu.memory_space<vmem>>, vector<1x8x32xf32>,
    return
  }
  func.func @transform_0(%arg0: i32, %arg1: i32, %arg2: i32) -> (i32, i32, i32) {
    %c0_i32 = arith.constant 0 : i32
    %c0_i32_0 = arith.constant 0 : i32
    return %arg0, %arg1, %c0_i32 : i32, i32, i32
  }
  func.func @transform_1(%arg0: i32, %arg1: i32, %arg2: i32) -> (i32, i32, i32) {
    %c0_i32 = arith.constant 0 : i32
    %c0_i32_0 = arith.constant 0 : i32
    %c0_i32_1 = arith.constant 0 : i32
    return %arg0, %c0_i32, %c0_i32_0 : i32, i32, i32
  }
  func.func @transform_2(%arg0: i32, %arg1: i32, %arg2: i32) -> (i32, i32, i32) {
    %c0_i32 = arith.constant 0 : i32
    %c0_i32_0 = arith.constant 0 : i32
    %c0_i32_1 = arith.constant 0 : i32
    return %arg0, %c0_i32, %c0_i32_0 : i32, i32, i32
  }
  func.func @transform_3(%arg0: i32, %arg1: i32, %arg2: i32) -> (i32, i32, i32) {
    %c0_i32 = arith.constant 0 : i32
    %c0_i32_0 = arith.constant 0 : i32
    %c0_i32_1 = arith.constant 0 : i32
    return %arg2, %c0_i32, %c0_i32_0 : i32, i32, i32
  }
  func.func @transform_4(%arg0: i32, %arg1: i32, %arg2: i32) -> (i32, i32, i32) {
    %c0_i32 = arith.constant 0 : i32
    %c0_i32_0 = arith.constant 0 : i32
    %c0_i32_1 = arith.constant 0 : i32
    return %arg2, %c0_i32, %c0_i32_0 : i32, i32, i32
  }
  func.func @transform_5(%arg0: i32, %arg1: i32, %arg2: i32) -> (i32, i32, i32) {
    %c0_i32 = arith.constant 0 : i32
    %c0_i32_0 = arith.constant 0 : i32
    %c0_i32_1 = arith.constant 0 : i32
    return %arg2, %c0_i32, %c0_i32_0 : i32, i32, i32
  }
  func.func @transform_6(%arg0: i32, %arg1: i32, %arg2: i32) -> (i32, i32, i32) {
    %c0_i32 = arith.constant 0 : i32
    %c0_i32_0 = arith.constant 0 : i32
    %c0_i32_1 = arith.constant 0 : i32
    return %arg2, %c0_i32, %c0_i32_0 : i32, i32, i32
  }
  func.func @transform_7(%arg0: i32, %arg1: i32, %arg2: i32) -> (i32, i32, i32) {
    %c0_i32 = arith.constant 0 : i32
    %c0_i32_0 = arith.constant 0 : i32
    %c0_i32_1 = arith.constant 0 : i32
    return %arg2, %c0_i32, %c0_i32_0 : i32, i32, i32
  }
  func.func @transform_8(%arg0: i32, %arg1: i32, %arg2: i32) -> (i32, i32, i32) {
    %c0_i32 = arith.constant 0 : i32
    %c0_i32_0 = arith.constant 0 : i32
    %c0_i32_1 = arith.constant 0 : i32
    return %arg2, %c0_i32, %c0_i32_0 : i32, i32, i32
  }
  func.func @transform_9(%arg0: i32, %arg1: i32, %arg2: i32) -> (i32, i32, i32) {
    %c0_i32 = arith.constant 0 : i32
    %c0_i32_0 = arith.constant 0 : i32
    %c0_i32_1 = arith.constant 0 : i32
    return %arg2, %c0_i32, %c0_i32_0 : i32, i32, i32
  }
  func.func @transform_10(%arg0: i32, %arg1: i32, %arg2: i32) -> (i32, i32) {
    %c0_i32 = arith.constant 0 : i32
    %c0_i32_0 = arith.constant 0 : i32
    %c0_i32_1 = arith.constant 0 : i32
    return %c0_i32, %c0_i32_0 : i32, i32
  }
  func.func @transform_11(%arg0: i32, %arg1: i32, %arg2: i32) -> (i32, i32, i32) {
    %c0_i32 = arith.constant 0 : i32
    %c0_i32_0 = arith.constant 0 : i32
    return %arg0, %arg1, %c0_i32 : i32, i32, i32
  }
  func.func @transform_12(%arg0: i32, %arg1: i32, %arg2: i32) -> (i32, i32, i32, i32) {
    %c0_i32 = arith.constant 0 : i32
    %c0_i32_0 = arith.constant 0 : i32
    return %arg0, %arg2, %arg1, %c0_i32 : i32, i32, i32, i32
  }
}

</mosaic_0001>

<bundles_post_ra>
// kernel: tpu_custom_call.1
= control target key start
LH: loop header
LB: loop body
LE: loop exit
PB: predicated region body
PF: predicated region fallthrough
CT: control target
= control target key end

     0   :  { %18 = vsyncpa [#allocation3], 0  ;;  %s2851_s0 = inlined_call_operand.hbm [shape: bf16[2,8,32], index: 0, kind: input, shape index: {}]   ;;  %s2852_s1 = inlined_call_operand.hbm [shape: bf16[2,8,32], index: 1, kind: input, shape index: {}]   ;;  %s2853_s2 = inlined_call_operand.hbm [shape: bf16[2,8,32], index: 2, kind: input, shape index: {}]   ;;  %s2854_s3 = inlined_call_operand.hbm [shape: bf16[1,32,32], index: 3, kind: input, shape index: {}]   ;;  %s2855_s4 = inlined_call_operand.vmem [shape: f32[1,1,32], index: 4, kind: input, shape index: {}]   ;;  %s2856_s5 = inlined_call_operand.vmem [shape: bf16[1,32,32], index: 5, kind: input, shape index: {}]   ;;  %s2857_s6 = inlined_call_operand.vmem [shape: f32[1,1,32], index: 6, kind: input, shape index: {}]   ;;  %s2858_s7 = inlined_call_operand.hbm [shape: bf16[1,32,32], index: 7, kind: input, shape index: {}]   ;;  %s2859_s8 = inlined_call_operand.hbm [shape: f32[1,1,32], index: 8, kind: input, shape index: {}]   ;;  %s2860_s9 = inlined_call_operand.vmem [shape: bf16[1,32,32], index: 9, kind: input, shape index: {}]   ;;  %s2861_s10 = inlined_call_operand.vmem [shape: f32[1,32], index: 10, kind: input, shape index: {}]   ;;  %s2862_s11 = inlined_call_operand.hbm [shape: f32[2,8,32], index: 11, kind: output, shape index: {0}]   ;;  %s2863_s12 = inlined_call_operand.hbm [shape: bf16[2,4,8,8], index: 12, kind: output, shape index: {1}]  }
   0x1   :  { %19 = vsyncpa [#allocation6], 0 }
   0x2   :  { %20 = vsyncpa [#allocation9], 0 }
   0x3   :  { %21 = vsyncpa [#allocation12], 0 }
   0x4   :  { %22 = vsyncpa [#allocation4], 0 }
   0x5   :  { %23 = vsyncpa [#allocation15], 0  ;;  %s2328_s21 = smov [#allocation5]   ;;  %s2329_s23 = smov [#allocation8]  }
   0x6   :  { %s41_s22 = sshll.u32 %s2328_s21, 4  ;;  %s65_s24 = sshll.u32 %s2329_s23, 4  ;;  %s42_s22 = int_to_ptr.vmem [resolvable:$true] %s41_s22  ;;  %s2410_s24 = int_to_ptr.vmem [resolvable:$true] %s65_s24 }
   0x7   :  { %s2140_s27 = scalar_lea.hbm %s2852_s1, 128 }
   0x8   :  { %p2141_p0 = scmp.ne.s32.totalorder %s2852_s1, %s2140_s27  ;;  %p2144_p1 = scmp.lt.u32.totalorder %s2140_s27, %s2852_s1 }
   0xa   :  { %p2146_p2 = pnand %p2144_p1, %p2141_p0 }
   0xc   :  { %2149 = shalt.err (!%p2146_p2)
}
   0xd   :  { %s2150_s14 = scalar_lea.vmem %s42_s22, 128  ;;  %p2155_p4 = scmp.lt.s32.totalorder %s42_s22, %s42_s22 }
   0xe   :  { %p2151_p3 = scmp.ne.s32.totalorder %s42_s22, %s2150_s14  ;;  %p2156_p5 = scmp.lt.s32.totalorder %s2150_s14, %s2150_s14 }
  0x10   :  { %p2157_p6 = por %p2156_p5, %p2155_p4 }
  0x12   :  { %p2158_p7 = pnand %p2157_p6, %p2151_p3 }
  0x14   :  { %2161 = shalt.err (!%p2158_p7)
}
  0x15   :  { %s2330_s15 = smov 64   ;;  %s2331_s16 = smov 4  }
  0x16   :  { %47 = dma.hbm_to_vmem [thread:$0]  %s2852_s1, 128, %s42_s22, [#allocation6], %s2330_s15, %s2330_s15, %s2331_s16  }
  0x17   :  { %s2162_s21 = scalar_lea.hbm %s2854_s3, 256 }
  0x18   :  { %p2163_p8 = scmp.ne.s32.totalorder %s2854_s3, %s2162_s21  ;;  %p2166_p9 = scmp.lt.u32.totalorder %s2162_s21, %s2854_s3 }
  0x1a   :  { %p2168_p10 = pnand %p2166_p9, %p2163_p8 }
  0x1c   :  { %2171 = shalt.err (!%p2168_p10)
}
  0x1d   :  { %s2172_s28 = scalar_lea.vmem %s2410_s24, 256  ;;  %p2177_p12 = scmp.lt.s32.totalorder %s2410_s24, %s2410_s24 }
  0x1e   :  { %p2173_p11 = scmp.ne.s32.totalorder %s2410_s24, %s2172_s28  ;;  %p2178_p13 = scmp.lt.s32.totalorder %s2172_s28, %s2172_s28 }
  0x20   :  { %p2179_p0 = por %p2178_p13, %p2177_p12 }
  0x22   :  { %p2180_p1 = pnand %p2179_p0, %p2173_p11 }
  0x24   :  { %2183 = shalt.err (!%p2180_p1)
}
  0x25   :  { %71 = dma.hbm_to_vmem [thread:$0]  %s2854_s3, 256, %s2410_s24, [#allocation9], %s2330_s15, %s2330_s15, %s2331_s16  }
  0x26   :  { %s2332_s29 = smov [#allocation2]   ;;  %s2333_s13 = smov [#allocation7]  }
  0x27   :  { %s29_s30 = sshll.u32 %s2332_s29, 4  ;;  %s53_s14 = sshll.u32 %s2333_s13, 4  ;;  %s30_s30 = int_to_ptr.vmem [resolvable:$true] %s29_s30  ;;  %s2447_s14 = int_to_ptr.vmem [resolvable:$true] %s53_s14 }
  0x28   :  { %s2184_s19 = scalar_lea.hbm %s2851_s0, 128 }
  0x29   :  { %p2185_p2 = scmp.ne.s32.totalorder %s2851_s0, %s2184_s19  ;;  %p2188_p3 = scmp.lt.u32.totalorder %s2184_s19, %s2851_s0 }
  0x2b   :  { %p2190_p4 = pnand %p2188_p3, %p2185_p2 }
  0x2d   :  { %2193 = shalt.err (!%p2190_p4)
}
  0x2e   :  { %s2194_s3 = scalar_lea.vmem %s30_s30, 128  ;;  %p2199_p6 = scmp.lt.s32.totalorder %s30_s30, %s30_s30 }
  0x2f   :  { %p2195_p5 = scmp.ne.s32.totalorder %s30_s30, %s2194_s3  ;;  %p2200_p7 = scmp.lt.s32.totalorder %s2194_s3, %s2194_s3 }
  0x31   :  { %p2201_p8 = por %p2200_p7, %p2199_p6 }
  0x33   :  { %p2202_p9 = pnand %p2201_p8, %p2195_p5 }
  0x35   :  { %2205 = shalt.err (!%p2202_p9)
}
  0x36   :  { %35 = dma.hbm_to_vmem [thread:$0]  %s2851_s0, 128, %s30_s30, [#allocation3], %s2330_s15, %s2330_s15, %s2331_s16  }
  0x37   :  { %s2206_s1 = scalar_lea.hbm %s2853_s2, 128 }
  0x38   :  { %p2207_p10 = scmp.ne.s32.totalorder %s2853_s2, %s2206_s1  ;;  %p2210_p11 = scmp.lt.u32.totalorder %s2206_s1, %s2853_s2 }
  0x3a   :  { %p2212_p12 = pnand %p2210_p11, %p2207_p10 }
  0x3c   :  { %2215 = shalt.err (!%p2212_p12)
}
  0x3d   :  { %s2216_s18 = scalar_lea.vmem %s2447_s14, 128  ;;  %p2221_p0 = scmp.lt.s32.totalorder %s2447_s14, %s2447_s14 }
  0x3e   :  { %p2217_p13 = scmp.ne.s32.totalorder %s2447_s14, %s2216_s18  ;;  %p2222_p1 = scmp.lt.s32.totalorder %s2216_s18, %s2216_s18 }
  0x40   :  { %p2223_p2 = por %p2222_p1, %p2221_p0 }
  0x42   :  { %p2224_p3 = pnand %p2223_p2, %p2217_p13 }
  0x44   :  { %2227 = shalt.err (!%p2224_p3)
}
  0x45   :  { %59 = dma.hbm_to_vmem [thread:$0]  %s2853_s2, 128, %s2447_s14, [#allocation6], %s2330_s15, %s2330_s15, %s2331_s16  }
  0x46   :  { %s2334_s19 = smov [#allocation10]   ;;  %s2335_s21 = smov [#allocation11]  }
  0x47   :  { %s83_s20 = sshll.u32 %s2334_s19, 4  ;;  %s96_s23 = sshll.u32 %s2335_s21, 4  ;;  %s84_s20 = int_to_ptr.vmem [resolvable:$true] %s83_s20  ;;  %s97_s23 = int_to_ptr.vmem [resolvable:$true] %s96_s23 }
  0x48   :  { %s2228_s24 = scalar_lea.hbm %s2858_s7, 256 }
  0x49   :  { %p2229_p4 = scmp.ne.s32.totalorder %s2858_s7, %s2228_s24  ;;  %p2232_p5 = scmp.lt.u32.totalorder %s2228_s24, %s2858_s7 }
  0x4b   :  { %p2234_p6 = pnand %p2232_p5, %p2229_p4 }
  0x4d   :  { %2237 = shalt.err (!%p2234_p6)
}
  0x4e   :  { %s2238_s2 = scalar_lea.vmem %s84_s20, 256  ;;  %p2243_p8 = scmp.lt.s32.totalorder %s84_s20, %s84_s20 }
  0x4f   :  { %p2239_p7 = scmp.ne.s32.totalorder %s84_s20, %s2238_s2  ;;  %p2244_p9 = scmp.lt.s32.totalorder %s2238_s2, %s2238_s2 }
  0x51   :  { %p2245_p10 = por %p2244_p9, %p2243_p8 }
  0x53   :  { %p2246_p11 = pnand %p2245_p10, %p2239_p7 }
  0x55   :  { %2249 = shalt.err (!%p2246_p11)
}
  0x56   :  { %89 = dma.hbm_to_vmem [thread:$0]  %s2858_s7, 256, %s84_s20, [#allocation9], %s2330_s15, %s2330_s15, %s2331_s16  }
  0x57   :  { %s2250_s17 = scalar_lea.hbm %s2859_s8, 16 }
  0x58   :  { %p2251_p12 = scmp.ne.s32.totalorder %s2859_s8, %s2250_s17  ;;  %p2254_p13 = scmp.lt.u32.totalorder %s2250_s17, %s2859_s8 }
  0x5a   :  { %p2256_p0 = pnand %p2254_p13, %p2251_p12 }
  0x5c   :  { %2259 = shalt.err (!%p2256_p0)
}
  0x5d   :  { %s2260_s21 = scalar_lea.vmem %s97_s23, 16  ;;  %s2264_s25 = scalar_lea.vmem %s97_s23, 32 }
  0x5e   :  { %p2261_p1 = scmp.ne.s32.totalorder %s97_s23, %s2260_s21  ;;  %p2265_p2 = scmp.lt.s32.totalorder %s97_s23, %s97_s23 }
  0x5f   :  { %p2266_p3 = scmp.lt.s32.totalorder %s2264_s25, %s2260_s21 }
  0x61   :  { %p2267_p4 = por %p2266_p3, %p2265_p2 }
  0x63   :  { %p2268_p5 = pnand %p2267_p4, %p2261_p1 }
  0x65   :  { %2271 = shalt.err (!%p2268_p5)
}
  0x66   :  { %99 = dma.hbm_to_vmem [thread:$0]  %s2859_s8, 16, %s97_s23, [#allocation12]  }
  0x67   :  { %2316 = dma.done.wait [#allocation3], 128  }
  0x68   :  { %2317 = vsyncadd [#allocation3], 4294967168 }
  0x69   :  { %2318 = dma.done.wait [#allocation6], 256  }
  0x6a   :  { %2319 = vsyncadd [#allocation6], 4294967040 }
  0x6b   :  { %2320 = dma.done.wait [#allocation9], 512  }
  0x6c   :  { %2321 = vsyncadd [#allocation9], 4294966784 }
  0x6d   :  { %2322 = dma.done.wait [#allocation12], 16  }
  0x6e   :  { %2323 = vsyncadd [#allocation12], 4294967280  ;;  %v2336_v0 = vmov 0.0   ;;  %vm2337_vm0 = vmmov 0   ;;  %v2520_v1 = vld [vmem:[%s2856_s5] sm:$0xff]   ;;  %v2525_v2 = vld [vmem:[%s2856_s5 + $0x8] sm:$0xff]  }
  0x6f   :  { %1901 = vmatprep.subr.bf16.mxu1 %v2336_v0  ;;  %1893 = vmatprep.subr.bf16.mxu0 %v2336_v0  ;;  %v2528_v3 = vld [vmem:[#allocation8] sm:$0xff]   ;;  %v2532_v4 = vld [vmem:[#allocation8 + $0x8] sm:$0xff]   ;;  %vm153_vm1 = vcmask 261120   ;;  %v220_v5 = vld [vmem:[#allocation5] sm:$0xf]  ;;  %vm346_vm2 = vcmask 64512  }
  0x70   :  { %1905 = vmatprep.mubr.msk.bf16.mxu1 %vm2337_vm0, %v2336_v0  ;;  %1897 = vmatprep.mubr.msk.bf16.mxu0 %vm2337_vm0, %v2336_v0  ;;  %v156_v6 = vld [vmem:[#allocation2] sm:$0xf]  ;;  %v2572_v22 = vld [vmem:[#allocation10] sm:$0xff]   ;;  %v2575_v23 = vld [vmem:[#allocation10 + $0x8] sm:$0xff]   ;;  %vm410_vm3 = vcmask 1043456   ;;  %vm405_vm4 = vcmask 60416  }
  0x71   :  { %1902 = vmatpush3.bf16.msra.mxu1 %v2520_v1  ;;  %1894 = vmatpush3.bf16.msra.mxu0 %v2528_v3  ;;  %v2548_v7 = vld [vmem:[%s2857_s6] ss:$0 sm:$0xff]  ;;  %s2338_s6 = smov 120   ;;  %v283_v24 = vld [vmem:[#allocation7] sm:$0xf]  ;;  %s2340_s29 = smov 104  }
  0x72   :  { %1903 = vmatprep.subr.bf16.mxu1 %v2336_v0  ;;  %1895 = vmatprep.subr.bf16.mxu0 %v2336_v0  ;;  %v2553_v9 = vld [vmem:[%s2855_s4] ss:$0 sm:$0xff]  ;;  %v2591_v47 = vld [vmem:[#allocation11] ss:$0 sm:$0xff]  ;;  %s2339_s4 = smov 112  }
  0x73   :  { %v136_v60 = vld [vmem:[%s2860_s9 + $0x4] sm:$0xf] }
  0x74   :  { %v2616_v61 = vsel %vm410_vm3, %v136_v60, 0 }
  0x75   :  { %1904 = vmatpush3.bf16.msra.mxu1 %v2525_v2  ;;  %1896 = vmatpush3.bf16.msra.mxu0 %v2532_v4 }
  0x76   :  { %1917 = vmatprep.subr.bf16.mxu1 %v2336_v0  ;;  %1909 = vmatprep.subr.bf16.mxu0 %v2336_v0 }
  0x78   :  { %1906 = vmatmul.mubr.msk.bf16.vlgmr.msra.gmra.mrb[0].mxu1 %vm153_vm1, %v220_v5  ;;  %1898 = vmatmul.mubr.msk.bf16.vlgmr.msra.gmra.mrb[0].mxu0 %vm153_vm1, %v156_v6 }
  0x79   :  { %1919 = vmatprep.mubr.msk.bf16.mxu1 %vm2337_vm0, %v2336_v0  ;;  %1913 = vmatprep.mubr.msk.bf16.mxu0 %vm2337_vm0, %v2336_v0 }
  0x7a   :  { %1910 = vmatpush3.bf16.msra.mxu0 %v2572_v22 }
  0x7b   :  { %1911 = vmatprep.subr.bf16.mxu0 %v2336_v0 }
  0x7e   :  { %1912 = vmatpush3.bf16.msra.mxu0 %v2575_v23 }
  0x7f   :  { %1923 = vmatprep.subr.bf16.mxu0 %v2336_v0 }
  0x81   :  { %1914 = vmatmul.mubr.msk.bf16.vlgmr.msra.gmra.mrb[4].mxu0 %vm153_vm1, %v283_v24 }
  0x82   :  { %1925 = vmatprep.mubr.msk.bf16.mxu0 %vm2337_vm0, %v2336_v0 }
 0x14b   :  { %v276_v8 = vpop.f32.mrb[0].mxu1  ;;  %v213_v13 = vpop.f32.mrb[0].mxu0 }
 0x14c   :  { %v277_v10 = vadd.f32 %v2548_v7, %v276_v8  ;;  %v1907_v11 = vpop.f32.mrb[1].mxu1  ;;  %v214_v16 = vadd.f32 %v2553_v9, %v213_v13  ;;  %v1899_v17 = vpop.f32.mrb[1].mxu0  ;;  %v135_v8 = vld [vmem:[%s2860_s9] sm:$0xf] }
 0x14d   :  { %v279_v12 = vpop.f32.mrb[2].mxu1  ;;  %v216_v18 = vpop.f32.mrb[2].mxu0 }
 0x14e   :  { %v2556_v14 = vpack.c.bf16 %v277_v10, %v277_v10  ;;  %v1908_v15 = vpop.f32.mrb[3].mxu1  ;;  %v2561_v19 = vpack.c.bf16 %v214_v16, %v214_v16  ;;  %v1900_v21 = vpop.f32.mrb[3].mxu0  ;;  %v2626_v12 = vsel %vm410_vm3, %v135_v8, 0 }
 0x150   :  { %459 = vrot.lane.b32.xlu0 %v2556_v14, %s2338_s6  ;;  %v351_v20 = vsel %vm346_vm2, %v2556_v14, 0 }
 0x151   :  { %1918 = vmatpush3.bf16.xpose.msra.mxu1 %v351_v20 }
 0x152   :  { %1929 = vmatprep.subr.bf16.mxu1 %v2336_v0 }
 0x154   :  { %456 = vrot.lane.b32.xlu0 %v2561_v19, %s2338_s6  ;;  %v339_v41 = vpop.f32.mrb[4].mxu0 }
 0x155   :  { %v1915_v42 = vpop.f32.mrb[5].mxu0  ;;  %v340_v48 = vadd.f32 %v2591_v47, %v339_v41 }
 0x156   :  { %v342_v43 = vpop.f32.mrb[6].mxu0 }
 0x157   :  { %v1916_v44 = vpop.f32.mrb[7].mxu0  ;;  %v2594_v49 = vpack.c.bf16 %v340_v48, %v340_v48 }
 0x158   :  { %1920 = vmatmul.mubr.msk.bf16.vlgmr.msra.gmra.mrb[4].mxu1 %vm346_vm2, %v2561_v19 }
 0x159   :  { %1931 = vmatprep.mubr.msk.bf16.mxu1 %vm2337_vm0, %v2336_v0  ;;  %v412_v50 = vsel %vm410_vm3, %v2594_v49, 0 }
 0x15a   :  { %1924 = vmatpush3.bf16.msra.mxu0 %v412_v50 }
 0x15b   :  { %1935 = vmatprep.subr.bf16.mxu0 %v2336_v0 }
 0x1c2   :  { %v460_v25 = vpop.permute.xlu0 %459 }
 0x1c3   :  { %v465_v26 = vsel %vm346_vm2, %v460_v25, 0 }
 0x1c4   :  { %1930 = vmatpush3.bf16.xpose.msra.mxu1 %v465_v26 }
 0x1c5   :  { %1941 = vmatprep.subr.bf16.mxu1 %v2336_v0 }
 0x1c6   :  { %v457_v27 = vpop.permute.xlu0 %456 }
 0x1cb   :  { %1932 = vmatmul.mubr.msk.bf16.vlgmr.msra.gmra.mrb[8].mxu1 %vm346_vm2, %v457_v27 }
 0x1cc   :  { %1943 = vmatprep.mubr.msk.bf16.mxu1 %vm2337_vm0, %v2336_v0  ;;  %1942 = vmatpush3.bf16.msra.mxu1 %v2616_v61 }
 0x1cd   :  { %1953 = vmatprep.subr.bf16.mxu1 %v2336_v0 }
 0x22b   :  { %v387_v28 = vpop.f32.mrb[4].mxu1 }
 0x22c   :  { %v1921_v29 = vpop.f32.mrb[5].mxu1  ;;  %v393_v30 = vsel %vm346_vm2, %v387_v28, -inf }
 0x22d   :  { %394 = vmax.xlane.f32.xlu1 %v393_v30  ;;  %v390_v31 = vpop.f32.mrb[6].mxu1 }
 0x22e   :  { %v1922_v32 = vpop.f32.mrb[7].mxu1 }
 0x29e   :  { %v501_v33 = vpop.f32.mrb[8].mxu1 }
 0x29f   :  { %v1933_v34 = vpop.f32.mrb[9].mxu1  ;;  %v507_v35 = vsel %vm346_vm2, %v501_v33, -inf }
 0x2a0   :  { %508 = vmax.xlane.f32.xlu1 %v507_v35  ;;  %v504_v36 = vpop.f32.mrb[10].mxu1 }
 0x2a1   :  { %v1934_v37 = vpop.f32.mrb[11].mxu1 }
 0x2ba   :  { %v395_v38 = vpop.xlane.xlu1 %394 }
 0x2bb   :  { %v396_v39 = vsub.f32 %v387_v28, %v395_v38 }
 0x2bd   :  { %v397_v40 = vmul.f32 1.442695, %v396_v39 }
 0x2bf   :  { %2108 = vpow2.f32 %v397_v40 }
 0x2c9   :  { %v2109_v45 = vpop.eup %2108 }
 0x2ca   :  { %v399_v46 = vsel %vm346_vm2, %v2109_v45, 0.0 }
 0x2cb   :  { %400 = vadd.xlane.f32.xlu0 %v399_v46 }
 0x2e1   :  { %727 = vrot.lane.b32.xlu0 %v2594_v49, %s2339_s4 }
 0x32d   :  { %v509_v51 = vpop.xlane.xlu1 %508 }
 0x32e   :  { %v510_v52 = vsub.f32 %v501_v33, %v509_v51 }
 0x330   :  { %v511_v53 = vmul.f32 1.442695, %v510_v52 }
 0x332   :  { %2110 = vpow2.f32 %v511_v53 }
 0x33c   :  { %v2111_v54 = vpop.eup %2110 }
 0x33d   :  { %v513_v55 = vsel %vm346_vm2, %v2111_v54, 0.0 }
 0x33e   :  { %514 = vadd.xlane.f32.xlu1 %v513_v55 }
 0x34f   :  { %522 = vrot.lane.b32.xlu1 %v2594_v49, %s2338_s6 }
 0x353   :  { %665 = vrot.lane.b32.xlu1 %v2556_v14, %s2339_s4 }
 0x357   :  { %663 = vrot.lane.b32.xlu1 %v2561_v19, %s2339_s4 }
 0x358   :  { %v401_v56 = vpop.xlane.xlu0 %400 }
 0x359   :  { %2112 = vrcp.f32 %v401_v56 }
 0x35c   :  { %v728_v13 = vpop.permute.xlu0 %727 }
 0x35d   :  { %v733_v20 = vsel %vm410_vm3, %v728_v13, 0 }
 0x363   :  { %v2113_v57 = vpop.eup %2112 }
 0x364   :  { %v403_v58 = vmul.f32 %v2113_v57, %v2109_v45 }
 0x366   :  { %v404_v59 = vpack.c.bf16 %v403_v58, %v403_v58 }
 0x368   :  { %406 = vst.msk [vmem:[#allocation14] sm:$0xf] %vm405_vm4, %v404_v59  ;;  %1926 = vmatmul.mubr.msk.bf16.vlgmr.msra.gmra.mrb[8].mxu0 %vm346_vm2, %v404_v59 }
 0x369   :  { %1937 = vmatprep.mubr.msk.bf16.mxu0 %vm2337_vm0, %v2336_v0 }
 0x3cb   :  { %v515_v62 = vpop.xlane.xlu1 %514 }
 0x3cc   :  { %2114 = vrcp.f32 %v515_v62 }
 0x3cf   :  { %v523_v63 = vpop.permute.xlu1 %522 }
 0x3d0   :  { %v528_v5 = vsel %vm410_vm3, %v523_v63, 0 }
 0x3d1   :  { %1936 = vmatpush3.bf16.msra.mxu0 %v528_v5 }
 0x3d2   :  { %1947 = vmatprep.subr.bf16.mxu0 %v2336_v0 }
 0x3d3   :  { %v666_v24 = vpop.permute.xlu1 %665 }
 0x3d4   :  { %v671_v29 = vsel %vm346_vm2, %v666_v24, 0  ;;  %v138_v24 = vld [vmem:[%s2860_s9 + $0xc] sm:$0xf] }
 0x3d6   :  { %v2115_v6 = vpop.eup %2114 }
 0x3d7   :  { %v517_v10 = vmul.f32 %v2115_v6, %v2111_v54  ;;  %v664_v31 = vpop.permute.xlu1 %663 }
 0x3d9   :  { %v518_v11 = vpack.c.bf16 %v517_v10, %v517_v10 }
 0x3db   :  { %520 = vst.msk [vmem:[#allocation14 + $0x4] sm:$0xf] %vm405_vm4, %v518_v11  ;;  %1938 = vmatmul.mubr.msk.bf16.vlgmr.msra.gmra.mrb[12].mxu0 %vm346_vm2, %v518_v11 }
 0x3dc   :  { %1948 = vmatpush3.bf16.msra.mxu0 %v2626_v12  ;;  %1949 = vmatprep.mubr.msk.bf16.mxu0 %vm2337_vm0, %v2336_v0 }
 0x3dd   :  { %1959 = vmatprep.subr.bf16.mxu0 %v2336_v0 }
 0x43b   :  { %v448_v15 = vpop.f32.mrb[8].mxu0 }
 0x43c   :  { %v454_v16 = vpack.c.bf16 %v448_v15, %v448_v15  ;;  %v1927_v17 = vpop.f32.mrb[9].mxu0 }
 0x43d   :  { %v451_v18 = vpop.f32.mrb[10].mxu0 }
 0x43e   :  { %v1928_v21 = vpop.f32.mrb[11].mxu0  ;;  %1950 = vmatmul.mubr.msk.bf16.vlgmr.msra.gmra.mrb[16].mxu0 %vm346_vm2, %v454_v16 }
 0x43f   :  { %1960 = vmatpush3.bf16.msra.mxu0 %v733_v20  ;;  %1961 = vmatprep.mubr.msk.bf16.mxu0 %vm2337_vm0, %v2336_v0 }
 0x440   :  { %1971 = vmatprep.subr.bf16.mxu0 %v2336_v0 }
 0x4ae   :  { %v564_v25 = vpop.f32.mrb[12].mxu0 }
 0x4af   :  { %v570_v26 = vpack.c.bf16 %v564_v25, %v564_v25  ;;  %v1939_v27 = vpop.f32.mrb[13].mxu0  ;;  %v2683_v25 = vsel %vm410_vm3, %v138_v24, 0 }
 0x4b0   :  { %v567_v28 = vpop.f32.mrb[14].mxu0 }
 0x4b1   :  { %v1940_v30 = vpop.f32.mrb[15].mxu0  ;;  %1944 = vmatmul.mubr.msk.bf16.vlgmr.msra.gmra.mrb[12].mxu1 %vm346_vm2, %v570_v26 }
 0x4b2   :  { %1954 = vmatpush3.bf16.xpose.msra.mxu1 %v671_v29  ;;  %1955 = vmatprep.mubr.msk.bf16.mxu1 %vm2337_vm0, %v2336_v0 }
 0x4b3   :  { %1965 = vmatprep.subr.bf16.mxu1 %v2336_v0 }
 0x4b9   :  { %1956 = vmatmul.mubr.msk.bf16.vlgmr.msra.gmra.mrb[16].mxu1 %vm346_vm2, %v664_v31 }
 0x4ba   :  { %1967 = vmatprep.mubr.msk.bf16.mxu1 %vm2337_vm0, %v2336_v0 }
 0x511   :  { %v657_v32 = vpop.f32.mrb[16].mxu0 }
 0x512   :  { %v1951_v33 = vpop.f32.mrb[17].mxu0 }
 0x513   :  { %v660_v34 = vpop.f32.mrb[18].mxu0 }
 0x514   :  { %v1952_v35 = vpop.f32.mrb[19].mxu0 }
 0x584   :  { %v611_v36 = vpop.f32.mrb[12].mxu1 }
 0x585   :  { %v2647_v37 = vadd.f32 %v657_v32, %v611_v36  ;;  %v1945_v38 = vpop.f32.mrb[13].mxu1  ;;  %v987_v36 = vld [vmem:[#allocation2 + $0x4] sm:$0xf] }
 0x586   :  { %v614_v39 = vpop.f32.mrb[14].mxu1 }
 0x587   :  { %v1946_v40 = vpop.f32.mrb[15].mxu1 }
 0x58c   :  { %v707_v41 = vpop.f32.mrb[16].mxu1 }
 0x58d   :  { %v1957_v42 = vpop.f32.mrb[17].mxu1  ;;  %v713_v43 = vsel %vm346_vm2, %v707_v41, -inf }
 0x58e   :  { %714 = vmax.xlane.f32.xlu1 %v713_v43  ;;  %v710_v44 = vpop.f32.mrb[18].mxu1 }
 0x58f   :  { %v1958_v45 = vpop.f32.mrb[19].mxu1 }
 0x61b   :  { %v715_v46 = vpop.xlane.xlu1 %714 }
 0x61c   :  { %v716_v48 = vsub.f32 %v707_v41, %v715_v46 }
 0x61e   :  { %v717_v50 = vmul.f32 1.442695, %v716_v48 }
 0x620   :  { %2116 = vpow2.f32 %v717_v50 }
 0x62a   :  { %v2117_v51 = vpop.eup %2116 }
 0x62b   :  { %v719_v52 = vsel %vm346_vm2, %v2117_v51, 0.0 }
 0x62c   :  { %720 = vadd.xlane.f32.xlu0 %v719_v52 }
 0x642   :  { %825 = vrot.lane.b32.xlu0 %v2556_v14, %s2340_s29 }
 0x646   :  { %823 = vrot.lane.b32.xlu0 %v2561_v19, %s2340_s29  ;;  %v137_v19 = vld [vmem:[%s2860_s9 + $0x8] sm:$0xf] }
 0x647   :  { %v2668_v59 = vsel %vm410_vm3, %v137_v19, 0 }
 0x648   :  { %1966 = vmatpush3.bf16.msra.mxu1 %v2668_v59 }
 0x649   :  { %1977 = vmatprep.subr.bf16.mxu1 %v2336_v0 }
 0x6b9   :  { %v721_v53 = vpop.xlane.xlu0 %720 }
 0x6ba   :  { %2118 = vrcp.f32 %v721_v53 }
 0x6bd   :  { %v826_v56 = vpop.permute.xlu0 %825 }
 0x6be   :  { %v831_v58 = vsel %vm346_vm2, %v826_v56, 0 }
 0x6c1   :  { %v824_v14 = vpop.permute.xlu0 %823 }
 0x6c4   :  { %v2119_v54 = vpop.eup %2118 }
 0x6c5   :  { %v723_v55 = vmul.f32 %v2119_v54, %v2117_v51 }
 0x6c7   :  { %v724_v57 = vpack.c.bf16 %v723_v55, %v723_v55 }
 0x6c9   :  { %726 = vst.msk [vmem:[#allocation14 + $0x8] sm:$0xf] %vm405_vm4, %v724_v57  ;;  %1962 = vmatmul.mubr.msk.bf16.vlgmr.msra.gmra.mrb[20].mxu0 %vm346_vm2, %v724_v57 }
 0x6ca   :  { %1972 = vmatpush3.bf16.xpose.msra.mxu0 %v831_v58  ;;  %1973 = vmatprep.mubr.msk.bf16.mxu0 %vm2337_vm0, %v2336_v0 }
 0x6cb   :  { %1983 = vmatprep.subr.bf16.mxu0 %v2336_v0 }
 0x6d1   :  { %1974 = vmatmul.mubr.msk.bf16.vlgmr.msra.gmra.mrb[24].mxu0 %vm346_vm2, %v824_v14 }
 0x6d2   :  { %1985 = vmatprep.mubr.msk.bf16.mxu0 %vm2337_vm0, %v2336_v0  ;;  %1984 = vmatpush3.bf16.msra.mxu0 %v2683_v25 }
 0x6d3   :  { %1997 = vmatprep.subr.bf16.mxu0 %v2336_v0 }
 0x79c   :  { %v769_v60 = vpop.f32.mrb[20].mxu0 }
 0x79d   :  { %v775_v62 = vpack.c.bf16 %v769_v60, %v769_v60  ;;  %v1963_v63 = vpop.f32.mrb[21].mxu0 }
 0x79e   :  { %v772_v5 = vpop.f32.mrb[22].mxu0 }
 0x79f   :  { %v1964_v6 = vpop.f32.mrb[23].mxu0  ;;  %1968 = vmatmul.mubr.msk.bf16.vlgmr.msra.gmra.mrb[20].mxu1 %vm346_vm2, %v775_v62 }
 0x7a0   :  { %1979 = vmatprep.mubr.msk.bf16.mxu1 %vm2337_vm0, %v2336_v0 }
 0x7a4   :  { %v867_v8 = vpop.f32.mrb[24].mxu0 }
 0x7a5   :  { %v1975_v10 = vpop.f32.mrb[25].mxu0  ;;  %v873_v11 = vsel %vm346_vm2, %v867_v8, -inf }
 0x7a6   :  { %874 = vmax.xlane.f32.xlu0 %v873_v11  ;;  %v870_v13 = vpop.f32.mrb[26].mxu0 }
 0x7a7   :  { %v1976_v15 = vpop.f32.mrb[27].mxu0 }
 0x833   :  { %v875_v16 = vpop.xlane.xlu0 %874 }
 0x834   :  { %v876_v17 = vsub.f32 %v867_v8, %v875_v16 }
 0x836   :  { %v877_v18 = vmul.f32 1.442695, %v876_v17 }
 0x838   :  { %2120 = vpow2.f32 %v877_v18 }
 0x842   :  { %v2121_v20 = vpop.eup %2120 }
 0x843   :  { %v879_v21 = vsel %vm346_vm2, %v2121_v20, 0.0 }
 0x844   :  { %880 = vadd.xlane.f32.xlu1 %v879_v21 }
 0x855   :  { %887 = vrot.lane.b32.xlu1 %v2594_v49, %s2340_s29 }
 0x872   :  { %v816_v26 = vpop.f32.mrb[20].mxu1 }
 0x873   :  { %v822_v27 = vadd.f32 %v816_v26, %v2647_v37  ;;  %v1969_v28 = vpop.f32.mrb[21].mxu1  ;;  %v1787_v37 = vld [vmem:[%s2861_s10] ss:$0 sm:$0xff]  ;;  %s2341_s10 = smov [#allocation14]  }
 0x874   :  { %v819_v29 = vpop.f32.mrb[22].mxu1  ;;  %154 = vst.msk [vmem:[#allocation13] sm:$0xff] %vm153_vm1, %v1787_v37  ;;  %155 = vst.msk [vmem:[#allocation13 + $0x8] sm:$0xff] %vm153_vm1, %v1787_v37  ;;  %s1768_s19 = sshll.u32 %s2341_s10, 4  ;;  %s1769_s19 = int_to_ptr.vmem [resolvable:$true] %s1768_s19 }
 0x875   :  { %v1970_v30 = vpop.f32.mrb[23].mxu1  ;;  %s2272_s21 = scalar_lea.vmem %s1769_s19, 512  ;;  %p2277_p7 = scmp.lt.s32.totalorder %s1769_s19, %s1769_s19 }
 0x876   :  { %p2273_p6 = scmp.ne.s32.totalorder %s1769_s19, %s2272_s21  ;;  %p2278_p8 = scmp.lt.s32.totalorder %s2272_s21, %s2272_s21 }
 0x878   :  { %p2279_p9 = por %p2278_p8, %p2277_p7 }
 0x87a   :  { %p2280_p10 = pnand %p2279_p9, %p2273_p6 }
 0x87b   :  { %v983_v44 = vld [vmem:[#allocation13] sm:$0xff] }
 0x8d1   :  { %v881_v31 = vpop.xlane.xlu1 %880 }
 0x8d2   :  { %2122 = vrcp.f32 %v881_v31 }
 0x8d5   :  { %v888_v49 = vpop.permute.xlu1 %887 }
 0x8d6   :  { %v893_v32 = vsel %vm410_vm3, %v888_v49, 0 }
 0x8d7   :  { %1978 = vmatpush3.bf16.msra.mxu1 %v893_v32 }
 0x8d8   :  { %1989 = vmatprep.subr.bf16.mxu1 %v2336_v0 }
 0x8dc   :  { %v2123_v33 = vpop.eup %2122 }
 0x8dd   :  { %v883_v34 = vmul.f32 %v2123_v33, %v2121_v20 }
 0x8df   :  { %v884_v35 = vpack.c.bf16 %v883_v34, %v883_v34 }
 0x8e1   :  { %886 = vst.msk [vmem:[#allocation14 + $0xc] sm:$0xf] %vm405_vm4, %v884_v35  ;;  %1980 = vmatmul.mubr.msk.bf16.vlgmr.msra.gmra.mrb[24].mxu1 %vm346_vm2, %v884_v35 }
 0x8e2   :  { %1990 = vmatpush3.bf16.msra.mxu1 %v2528_v3  ;;  %1993 = vmatprep.mubr.msk.bf16.mxu1 %vm2337_vm0, %v2336_v0 }
 0x8e3   :  { %1991 = vmatprep.subr.bf16.mxu1 %v2336_v0 }
 0x8e6   :  { %1992 = vmatpush3.bf16.msra.mxu1 %v2532_v4 }
 0x8e7   :  { %2005 = vmatprep.subr.bf16.mxu1 %v2336_v0 }
 0x8e9   :  { %1994 = vmatmul.mubr.msk.bf16.vlgmr.msra.gmra.mrb[28].mxu1 %vm153_vm1, %v987_v36 }
 0x8ea   :  { %2006 = vmatpush3.bf16.msra.mxu1 %v2572_v22  ;;  %2009 = vmatprep.mubr.msk.bf16.mxu1 %vm2337_vm0, %v2336_v0  ;;  %v1033_v22 = vld [vmem:[#allocation5 + $0x4] sm:$0xf] }
 0x8eb   :  { %2007 = vmatprep.subr.bf16.mxu1 %v2336_v0 }
 0x8ee   :  { %2008 = vmatpush3.bf16.msra.mxu1 %v2575_v23 }
 0x8ef   :  { %2019 = vmatprep.subr.bf16.mxu1 %v2336_v0 }
 0x9b4   :  { %v929_v3 = vpop.f32.mrb[24].mxu1 }
 0x9b5   :  { %v935_v4 = vpack.c.bf16 %v929_v3, %v929_v3  ;;  %v1981_v38 = vpop.f32.mrb[25].mxu1 }
 0x9b6   :  { %v932_v39 = vpop.f32.mrb[26].mxu1 }
 0x9b7   :  { %v1982_v40 = vpop.f32.mrb[27].mxu1  ;;  %1986 = vmatmul.mubr.msk.bf16.vlgmr.msra.gmra.mrb[28].mxu0 %vm346_vm2, %v935_v4 }
 0x9b8   :  { %1998 = vmatpush3.bf16.msra.mxu0 %v2520_v1  ;;  %2001 = vmatprep.mubr.msk.bf16.mxu0 %vm2337_vm0, %v2336_v0 }
 0x9b9   :  { %1999 = vmatprep.subr.bf16.mxu0 %v2336_v0 }
 0x9bc   :  { %2000 = vmatpush3.bf16.msra.mxu0 %v2525_v2  ;;  %v1025_v23 = vpop.f32.mrb[28].mxu1 }
 0x9bd   :  { %2013 = vmatprep.subr.bf16.mxu0 %v2336_v0  ;;  %v1995_v41 = vpop.f32.mrb[29].mxu1  ;;  %v1026_v54 = vadd.f32 %v2553_v9, %v1025_v23 }
 0x9be   :  { %v1028_v42 = vpop.f32.mrb[30].mxu1 }
 0x9bf   :  { %2002 = vmatmul.mubr.msk.bf16.vlgmr.msra.gmra.mrb[32].mxu0 %vm153_vm1, %v1033_v22  ;;  %v1996_v43 = vpop.f32.mrb[31].mxu1  ;;  %v2727_v58 = vpack.c.bf16 %v1026_v54, %v1026_v54 }
 0x9c0   :  { %2015 = vmatprep.mubr.msk.bf16.mxu0 %vm2337_vm0, %v2336_v0 }
 0xa8a   :  { %v976_v1 = vpop.f32.mrb[28].mxu0 }
 0xa8b   :  { %v982_v45 = vadd.f32 %v976_v1, %v822_v27  ;;  %v1987_v46 = vpop.f32.mrb[29].mxu0 }
 0xa8c   :  { %v979_v48 = vpop.f32.mrb[30].mxu0 }
 0xa8d   :  { %v984_v50 = vadd.f32 %v983_v44, %v982_v45  ;;  %v1988_v51 = vpop.f32.mrb[31].mxu0 }
 0xa8f   :  { %985 = vst.msk [vmem:[#allocation13] sm:$0xff] %vm153_vm1, %v984_v50 }
 0xa92   :  { %v1071_v2 = vpop.f32.mrb[32].mxu0 }
 0xa93   :  { %v1072_v52 = vadd.f32 %v2548_v7, %v1071_v2  ;;  %v2003_v53 = vpop.f32.mrb[33].mxu0  ;;  %v1079_v7 = vld [vmem:[#allocation7 + $0x4] sm:$0xf] }
 0xa94   :  { %v1074_v55 = vpop.f32.mrb[34].mxu0  ;;  %2010 = vmatmul.mubr.msk.bf16.vlgmr.msra.gmra.mrb[32].mxu1 %vm153_vm1, %v1079_v7 }
 0xa95   :  { %v2723_v56 = vpack.c.bf16 %v1072_v52, %v1072_v52  ;;  %v2004_v57 = vpop.f32.mrb[35].mxu0  ;;  %2021 = vmatprep.mubr.msk.bf16.mxu1 %vm2337_vm0, %v2336_v0 }
 0xa97   :  { %1235 = vrot.lane.b32.xlu1 %v2723_v56, %s2338_s6  ;;  %v1128_v14 = vsel %vm346_vm2, %v2723_v56, 0 }
 0xa98   :  { %2014 = vmatpush3.bf16.xpose.msra.mxu0 %v1128_v14 }
 0xa99   :  { %2025 = vmatprep.subr.bf16.mxu0 %v2336_v0 }
 0xa9b   :  { %1232 = vrot.lane.b32.xlu1 %v2727_v58, %s2338_s6 }
 0xa9f   :  { %2016 = vmatmul.mubr.msk.bf16.vlgmr.msra.gmra.mrb[36].mxu0 %vm346_vm2, %v2727_v58 }
 0xaa0   :  { %2027 = vmatprep.mubr.msk.bf16.mxu0 %vm2337_vm0, %v2336_v0 }
 0xb09   :  { %v1236_v9 = vpop.permute.xlu1 %1235 }
 0xb0a   :  { %v1241_v19 = vsel %vm346_vm2, %v1236_v9, 0 }
 0xb0b   :  { %2026 = vmatpush3.bf16.xpose.msra.mxu0 %v1241_v19 }
 0xb0c   :  { %2037 = vmatprep.subr.bf16.mxu0 %v2336_v0 }
 0xb0d   :  { %v1233_v60 = vpop.permute.xlu1 %1232 }
 0xb12   :  { %2028 = vmatmul.mubr.msk.bf16.vlgmr.msra.gmra.mrb[40].mxu0 %vm346_vm2, %v1233_v60 }
 0xb13   :  { %2038 = vmatpush3.bf16.msra.mxu0 %v2616_v61  ;;  %2039 = vmatprep.mubr.msk.bf16.mxu0 %vm2337_vm0, %v2336_v0 }
 0xb14   :  { %2049 = vmatprep.subr.bf16.mxu0 %v2336_v0 }
 0xb67   :  { %v1117_v20 = vpop.f32.mrb[32].mxu1 }
 0xb68   :  { %v2011_v21 = vpop.f32.mrb[33].mxu1  ;;  %v1118_v29 = vadd.f32 %v2591_v47, %v1117_v20 }
 0xb69   :  { %v1120_v24 = vpop.f32.mrb[34].mxu1 }
 0xb6a   :  { %v2012_v26 = vpop.f32.mrb[35].mxu1  ;;  %v2754_v30 = vpack.c.bf16 %v1118_v29, %v1118_v29 }
 0xb6c   :  { %v1188_v31 = vsel %vm410_vm3, %v2754_v30, 0 }
 0xb6d   :  { %2020 = vmatpush3.bf16.msra.mxu1 %v1188_v31 }
 0xb6e   :  { %2031 = vmatprep.subr.bf16.mxu1 %v2336_v0 }
 0xb72   :  { %v1164_v62 = vpop.f32.mrb[36].mxu0 }
 0xb73   :  { %v2017_v63 = vpop.f32.mrb[37].mxu0  ;;  %v1170_v5 = vsel %vm346_vm2, %v1164_v62, -inf }
 0xb74   :  { %1171 = vmax.xlane.f32.xlu1 %v1170_v5  ;;  %v1167_v6 = vpop.f32.mrb[38].mxu0 }
 0xb75   :  { %v2018_v8 = vpop.f32.mrb[39].mxu0 }
 0xb85   :  { %1433 = vrot.lane.b32.xlu1 %v2727_v58, %s2339_s4 }
 0xbe5   :  { %v1277_v10 = vpop.f32.mrb[40].mxu0 }
 0xbe6   :  { %v2029_v11 = vpop.f32.mrb[41].mxu0  ;;  %v1283_v13 = vsel %vm346_vm2, %v1277_v10, -inf }
 0xbe7   :  { %1284 = vmax.xlane.f32.xlu0 %v1283_v13  ;;  %v1280_v61 = vpop.f32.mrb[42].mxu0 }
 0xbe8   :  { %v2030_v15 = vpop.f32.mrb[43].mxu0 }
 0xc01   :  { %v1172_v16 = vpop.xlane.xlu1 %1171 }
 0xc02   :  { %v1173_v17 = vsub.f32 %v1164_v62, %v1172_v16 }
 0xc04   :  { %v1174_v18 = vmul.f32 1.442695, %v1173_v17 }
 0xc05   :  { %v1434_v52 = vpop.permute.xlu1 %1433 }
 0xc06   :  { %2124 = vpow2.f32 %v1174_v18 }
 0xc10   :  { %v2125_v27 = vpop.eup %2124 }
 0xc11   :  { %v1176_v28 = vsel %vm346_vm2, %v2125_v27, 0.0 }
 0xc12   :  { %1177 = vadd.xlane.f32.xlu0 %v1176_v28 }
 0xc74   :  { %v1285_v49 = vpop.xlane.xlu0 %1284 }
 0xc75   :  { %v1286_v32 = vsub.f32 %v1277_v10, %v1285_v49 }
 0xc77   :  { %v1287_v33 = vmul.f32 1.442695, %v1286_v32 }
 0xc79   :  { %2126 = vpow2.f32 %v1287_v33 }
 0xc83   :  { %v2127_v34 = vpop.eup %2126 }
 0xc84   :  { %v1289_v35 = vsel %vm346_vm2, %v2127_v34, 0.0 }
 0xc85   :  { %1290 = vadd.xlane.f32.xlu0 %v1289_v35 }
 0xc9b   :  { %1298 = vrot.lane.b32.xlu0 %v2754_v30, %s2338_s6 }
 0xc9f   :  { %1435 = vrot.lane.b32.xlu0 %v2723_v56, %s2339_s4  ;;  %v1178_v47 = vpop.xlane.xlu0 %1177 }
 0xca0   :  { %2128 = vrcp.f32 %v1178_v47 }
 0xcaa   :  { %v2129_v36 = vpop.eup %2128 }
 0xcab   :  { %v1180_v37 = vmul.f32 %v2129_v36, %v2125_v27 }
 0xcad   :  { %v1181_v3 = vpack.c.bf16 %v1180_v37, %v1180_v37 }
 0xcaf   :  { %1183 = vst.msk [vmem:[#allocation14 + $0x10] sm:$0xf] %vm405_vm4, %v1181_v3  ;;  %2022 = vmatmul.mubr.msk.bf16.vlgmr.msra.gmra.mrb[36].mxu1 %vm346_vm2, %v1181_v3 }
 0xcb0   :  { %2033 = vmatprep.mubr.msk.bf16.mxu1 %vm2337_vm0, %v2336_v0 }
 0xd12   :  { %v1291_v4 = vpop.xlane.xlu0 %1290 }
 0xd13   :  { %2130 = vrcp.f32 %v1291_v4 }
 0xd16   :  { %v1299_v38 = vpop.permute.xlu0 %1298 }
 0xd17   :  { %v1304_v39 = vsel %vm410_vm3, %v1299_v38, 0 }
 0xd18   :  { %2032 = vmatpush3.bf16.msra.mxu1 %v1304_v39 }
 0xd19   :  { %2043 = vmatprep.subr.bf16.mxu1 %v2336_v0 }
 0xd1a   :  { %v1436_v45 = vpop.permute.xlu0 %1435 }
 0xd1b   :  { %v1441_v51 = vsel %vm346_vm2, %v1436_v45, 0 }
 0xd1d   :  { %v2131_v40 = vpop.eup %2130 }
 0xd1e   :  { %v1293_v22 = vmul.f32 %v2131_v40, %v2127_v34 }
 0xd20   :  { %v1294_v23 = vpack.c.bf16 %v1293_v22, %v1293_v22 }
 0xd22   :  { %1296 = vst.msk [vmem:[#allocation14 + $0x14] sm:$0xf] %vm405_vm4, %v1294_v23  ;;  %2034 = vmatmul.mubr.msk.bf16.vlgmr.msra.gmra.mrb[40].mxu1 %vm346_vm2, %v1294_v23 }
 0xd23   :  { %2044 = vmatpush3.bf16.msra.mxu1 %v2626_v12  ;;  %2045 = vmatprep.mubr.msk.bf16.mxu1 %vm2337_vm0, %v2336_v0 }
 0xd24   :  { %2055 = vmatprep.subr.bf16.mxu1 %v2336_v0 }
 0xd82   :  { %v1224_v41 = vpop.f32.mrb[36].mxu1 }
 0xd83   :  { %v1230_v42 = vpack.c.bf16 %v1224_v41, %v1224_v41  ;;  %v2023_v43 = vpop.f32.mrb[37].mxu1 }
 0xd84   :  { %v1227_v1 = vpop.f32.mrb[38].mxu1 }
 0xd85   :  { %v2024_v44 = vpop.f32.mrb[39].mxu1  ;;  %2046 = vmatmul.mubr.msk.bf16.vlgmr.msra.gmra.mrb[44].mxu1 %vm346_vm2, %v1230_v42 }
 0xd86   :  { %2057 = vmatprep.mubr.msk.bf16.mxu1 %vm2337_vm0, %v2336_v0 }
 0xdf5   :  { %v1340_v46 = vpop.f32.mrb[40].mxu1 }
 0xdf6   :  { %v1346_v48 = vpack.c.bf16 %v1340_v46, %v1340_v46  ;;  %v2035_v50 = vpop.f32.mrb[41].mxu1 }
 0xdf7   :  { %v1343_v12 = vpop.f32.mrb[42].mxu1 }
 0xdf8   :  { %v2036_v2 = vpop.f32.mrb[43].mxu1  ;;  %2040 = vmatmul.mubr.msk.bf16.vlgmr.msra.gmra.mrb[44].mxu0 %vm346_vm2, %v1346_v48 }
 0xdf9   :  { %2050 = vmatpush3.bf16.xpose.msra.mxu0 %v1441_v51  ;;  %2051 = vmatprep.mubr.msk.bf16.mxu0 %vm2337_vm0, %v2336_v0 }
 0xdfa   :  { %2061 = vmatprep.subr.bf16.mxu0 %v2336_v0 }
 0xe00   :  { %2052 = vmatmul.mubr.msk.bf16.vlgmr.msra.gmra.mrb[48].mxu0 %vm346_vm2, %v1434_v52 }
 0xe01   :  { %2062 = vmatpush3.bf16.msra.mxu0 %v2668_v59  ;;  %2063 = vmatprep.mubr.msk.bf16.mxu0 %vm2337_vm0, %v2336_v0 }
 0xe02   :  { %2073 = vmatprep.subr.bf16.mxu0 %v2336_v0 }
 0xe58   :  { %v1427_v53 = vpop.f32.mrb[44].mxu1 }
 0xe59   :  { %v2047_v54 = vpop.f32.mrb[45].mxu1 }
 0xe5a   :  { %v1430_v55 = vpop.f32.mrb[46].mxu1 }
 0xe5b   :  { %v2048_v57 = vpop.f32.mrb[47].mxu1 }
 0xecb   :  { %v1384_v14 = vpop.f32.mrb[44].mxu0 }
 0xecc   :  { %v2789_v7 = vadd.f32 %v1427_v53, %v1384_v14  ;;  %v2041_v9 = vpop.f32.mrb[45].mxu0 }
 0xecd   :  { %v1387_v19 = vpop.f32.mrb[46].mxu0 }
 0xece   :  { %v2042_v60 = vpop.f32.mrb[47].mxu0 }
 0xed3   :  { %v1477_v62 = vpop.f32.mrb[48].mxu0 }
 0xed4   :  { %v2053_v63 = vpop.f32.mrb[49].mxu0  ;;  %v1483_v5 = vsel %vm346_vm2, %v1477_v62, -inf }
 0xed5   :  { %1484 = vmax.xlane.f32.xlu0 %v1483_v5  ;;  %v1480_v59 = vpop.f32.mrb[50].mxu0 }
 0xed6   :  { %v2054_v6 = vpop.f32.mrb[51].mxu0 }
 0xeeb   :  { %1497 = vrot.lane.b32.xlu0 %v2754_v30, %s2339_s4 }
 0xeef   :  { %1590 = vrot.lane.b32.xlu0 %v2727_v58, %s2340_s29 }
 0xf62   :  { %v1485_v8 = vpop.xlane.xlu0 %1484 }
 0xf63   :  { %v1486_v10 = vsub.f32 %v1477_v62, %v1485_v8 }
 0xf65   :  { %v1487_v11 = vmul.f32 1.442695, %v1486_v10 }
 0xf66   :  { %v1498_v13 = vpop.permute.xlu0 %1497 }
 0xf67   :  { %2132 = vpow2.f32 %v1487_v11  ;;  %v1503_v61 = vsel %vm410_vm3, %v1498_v13, 0 }
 0xf68   :  { %2056 = vmatpush3.bf16.msra.mxu1 %v1503_v61 }
 0xf69   :  { %2067 = vmatprep.subr.bf16.mxu1 %v2336_v0 }
 0xf6a   :  { %v1591_v26 = vpop.permute.xlu0 %1590 }
 0xf71   :  { %v2133_v15 = vpop.eup %2132 }
 0xf72   :  { %v1489_v16 = vsel %vm346_vm2, %v2133_v15, 0.0 }
 0xf73   :  { %1490 = vadd.xlane.f32.xlu1 %v1489_v16 }
 0xf84   :  { %1592 = vrot.lane.b32.xlu1 %v2723_v56, %s2340_s29 }
0x1000   :  { %v1491_v17 = vpop.xlane.xlu1 %1490 }
0x1001   :  { %2134 = vrcp.f32 %v1491_v17 }
0x1004   :  { %v1593_v20 = vpop.permute.xlu1 %1592 }
0x1005   :  { %v1598_v24 = vsel %vm346_vm2, %v1593_v20, 0 }
0x100b   :  { %v2135_v58 = vpop.eup %2134 }
0x100c   :  { %v1493_v18 = vmul.f32 %v2135_v58, %v2133_v15 }
0x100e   :  { %v1494_v21 = vpack.c.bf16 %v1493_v18, %v1493_v18 }
0x1010   :  { %1496 = vst.msk [vmem:[#allocation14 + $0x18] sm:$0xf] %vm405_vm4, %v1494_v21  ;;  %2058 = vmatmul.mubr.msk.bf16.vlgmr.msra.gmra.mrb[48].mxu1 %vm346_vm2, %v1494_v21 }
0x1011   :  { %2068 = vmatpush3.bf16.xpose.msra.mxu1 %v1598_v24  ;;  %2069 = vmatprep.mubr.msk.bf16.mxu1 %vm2337_vm0, %v2336_v0 }
0x1012   :  { %2079 = vmatprep.subr.bf16.mxu1 %v2336_v0 }
0x1018   :  { %2070 = vmatmul.mubr.msk.bf16.vlgmr.msra.gmra.mrb[52].mxu1 %vm346_vm2, %v1591_v26 }
0x1019   :  { %2080 = vmatpush3.bf16.msra.mxu1 %v2683_v25  ;;  %2081 = vmatprep.mubr.msk.bf16.mxu1 %vm2337_vm0, %v2336_v0 }
0x10e3   :  { %v1539_v56 = vpop.f32.mrb[48].mxu1 }
0x10e4   :  { %v1545_v27 = vpack.c.bf16 %v1539_v56, %v1539_v56  ;;  %v2059_v28 = vpop.f32.mrb[49].mxu1 }
0x10e5   :  { %v1542_v29 = vpop.f32.mrb[50].mxu1 }
0x10e6   :  { %v2060_v31 = vpop.f32.mrb[51].mxu1  ;;  %2064 = vmatmul.mubr.msk.bf16.vlgmr.msra.gmra.mrb[52].mxu0 %vm346_vm2, %v1545_v27 }
0x10e7   :  { %2075 = vmatprep.mubr.msk.bf16.mxu0 %vm2337_vm0, %v2336_v0 }
0x10eb   :  { %v1634_v49 = vpop.f32.mrb[52].mxu1 }
0x10ec   :  { %v2071_v32 = vpop.f32.mrb[53].mxu1  ;;  %v1640_v33 = vsel %vm346_vm2, %v1634_v49, -inf }
0x10ed   :  { %1641 = vmax.xlane.f32.xlu0 %v1640_v33  ;;  %v1637_v34 = vpop.f32.mrb[54].mxu1 }
0x10ee   :  { %v2072_v25 = vpop.f32.mrb[55].mxu1 }
0x1103   :  { %1654 = vrot.lane.b32.xlu0 %v2754_v30, %s2340_s29 }
0x117a   :  { %v1642_v35 = vpop.xlane.xlu0 %1641 }
0x117b   :  { %v1643_v47 = vsub.f32 %v1634_v49, %v1642_v35 }
0x117d   :  { %v1644_v36 = vmul.f32 1.442695, %v1643_v47 }
0x117e   :  { %v1655_v37 = vpop.permute.xlu0 %1654 }
0x117f   :  { %2136 = vpow2.f32 %v1644_v36  ;;  %v1660_v3 = vsel %vm410_vm3, %v1655_v37, 0 }
0x1180   :  { %2074 = vmatpush3.bf16.msra.mxu0 %v1660_v3 }
0x1189   :  { %v2137_v4 = vpop.eup %2136 }
0x118a   :  { %v1646_v0 = vsel %vm346_vm2, %v2137_v4, 0.0 }
0x118b   :  { %1647 = vadd.xlane.f32.xlu1 %v1646_v0 }
0x11b9   :  { %v1583_v38 = vpop.f32.mrb[52].mxu0 }
0x11ba   :  { %v1589_v39 = vadd.f32 %v1583_v38, %v2789_v7  ;;  %v2065_v40 = vpop.f32.mrb[53].mxu0 }
0x11bb   :  { %v1586_v22 = vpop.f32.mrb[54].mxu0 }
0x11bc   :  { %v2066_v23 = vpop.f32.mrb[55].mxu0 }
0x1218   :  { %v1648_v41 = vpop.xlane.xlu1 %1647 }
0x1219   :  { %2138 = vrcp.f32 %v1648_v41 }
0x1223   :  { %v2139_v30 = vpop.eup %2138 }
0x1224   :  { %v1650_v42 = vmul.f32 %v2139_v30, %v2137_v4 }
0x1226   :  { %v1651_v43 = vpack.c.bf16 %v1650_v42, %v1650_v42 }
0x1228   :  { %1653 = vst.msk [vmem:[#allocation14 + $0x1c] sm:$0xf] %vm405_vm4, %v1651_v43  ;;  %2076 = vmatmul.mubr.msk.bf16.vlgmr.msra.gmra.mrb[56].mxu0 %vm346_vm2, %v1651_v43 }
0x12fb   :  { %v1696_v1 = vpop.f32.mrb[56].mxu0 }
0x12fc   :  { %v1702_v44 = vpack.c.bf16 %v1696_v1, %v1696_v1  ;;  %v2077_v45 = vpop.f32.mrb[57].mxu0 }
0x12fd   :  { %v1699_v46 = vpop.f32.mrb[58].mxu0 }
0x12fe   :  { %v2078_v48 = vpop.f32.mrb[59].mxu0  ;;  %2082 = vmatmul.mubr.msk.bf16.vlgmr.msra.gmra.mrb[56].mxu1 %vm346_vm2, %v1702_v44 }
0x12ff   :  { %2283 = shalt.err (!%p2280_p10)
}
0x1300   :  { %s2284_s20 = scalar_lea.hbm %s2863_s12, 512 }
0x1301   :  { %p2285_p11 = scmp.ne.s32.totalorder %s2863_s12, %s2284_s20  ;;  %p2288_p12 = scmp.lt.u32.totalorder %s2284_s20, %s2863_s12 }
0x1303   :  { %p2290_p13 = pnand %p2288_p12, %p2285_p11 }
0x1305   :  { %2293 = shalt.err (!%p2290_p13)
}
0x1306   :  { %1774 = dma.vmem_to_hbm [thread:$0]  %s1769_s19, 512, %s2863_s12, [#allocation15], %s2330_s15, %s2330_s15, %s2331_s16   ;;  %v1748_v12 = vld [vmem:[#allocation13 + $0x8] sm:$0xff] }
0x1307   :  { %s2342_s27 = smov [#allocation13]  }
0x1308   :  { %s1756_s28 = sshll.u32 %s2342_s27, 4  ;;  %s1757_s28 = int_to_ptr.vmem [resolvable:$true] %s1756_s28 }
0x1309   :  { %s2294_s6 = scalar_lea.vmem %s1757_s28, 256  ;;  %p2299_p1 = scmp.lt.s32.totalorder %s1757_s28, %s1757_s28 }
0x130a   :  { %p2295_p0 = scmp.ne.s32.totalorder %s1757_s28, %s2294_s6  ;;  %p2300_p2 = scmp.lt.s32.totalorder %s2294_s6, %s2294_s6 }
0x130c   :  { %p2301_p3 = por %p2300_p2, %p2299_p1 }
0x130e   :  { %p2302_p4 = pnand %p2301_p3, %p2295_p0 }
0x13d1   :  { %v1740_v50 = vpop.f32.mrb[56].mxu1 }
0x13d2   :  { %v1746_v51 = vadd.f32 %v1740_v50, %v1589_v39  ;;  %v2083_v2 = vpop.f32.mrb[57].mxu1 }
0x13d3   :  { %v1743_v52 = vpop.f32.mrb[58].mxu1 }
0x13d4   :  { %v1749_v53 = vadd.f32 %v1748_v12, %v1746_v51  ;;  %v2084_v54 = vpop.f32.mrb[59].mxu1 }
0x13d6   :  { %1750 = vst.msk [vmem:[#allocation13 + $0x8] sm:$0xff] %vm153_vm1, %v1749_v53 }
0x13d7   :  { %2305 = shalt.err (!%p2302_p4)
}
0x13d8   :  { %s2306_s16 = scalar_lea.hbm %s2862_s11, 256 }
0x13d9   :  { %p2307_p5 = scmp.ne.s32.totalorder %s2862_s11, %s2306_s16  ;;  %p2310_p6 = scmp.lt.u32.totalorder %s2306_s16, %s2862_s11 }
0x13db   :  { %p2312_p7 = pnand %p2310_p6, %p2307_p5 }
0x13dd   :  { %2315 = shalt.err (!%p2312_p7)
}
0x13de   :  { %s2343_s22 = smov 128   ;;  %s2344_s29 = smov 8  }
0x13df   :  { %1762 = dma.vmem_to_hbm [thread:$0]  %s1757_s28, 256, %s2862_s11, [#allocation4], %s2343_s22, %s2343_s22, %s2344_s29  }
0x13e0   :  { %2324 = dma.done.wait [#allocation4], 256  }
0x13e1   :  { %2325 = vsyncadd [#allocation4], 4294967040 }
0x13e2   :  { %2326 = dma.done.wait [#allocation15], 512  }
0x13e3   :  { %2327 = vsyncadd [#allocation15], 4294966784 }
0x13e4   :  { %1781 = vsyncpa [#allocation3], 1 }
0x13e5   :  { %1782 = vsyncpa [#allocation6], 1 }
0x13e6   :  { %1783 = vsyncpa [#allocation9], 1 }
0x13e7   :  { %1784 = vsyncpa [#allocation12], 1 }
0x13e8   :  { %1785 = vsyncpa [#allocation4], 1 }
0x13e9   :  { %1786 = vsyncpa [#allocation15], 1 }

</bundles_post_ra>
